<compile_context>
chip_gen: v5e
topology: v5e:2x2
jax: 0.10.0
libtpu: 0.0.40
codegen_flags: <defaults>
</compile_context>

<pallas_src>
import functools

import jax
import jax.numpy as jnp
from jax.experimental import pallas as pl
from jax.experimental.pallas import tpu as pltpu


def _spatial_attention_kernel(x_ref, w_ref, o_ref, *, W, K):
    """x_ref/o_ref: (block_b, C, HWp) VMEM blocks; w_ref: (2*K*K,) f32 in SMEM."""
    P = K // 2
    bB, C, HWp = x_ref.shape
    MAXOFF = P * W + P                       # largest |flat shift| of any tap

    x = x_ref[...]
    xf = x.astype(jnp.float32)               # (bB, C, HWp)

    # Channel-wise pooling (reduction over the sublane axis).
    avg = jnp.mean(xf, axis=1)               # (bB, HWp)
    mx = jnp.max(xf, axis=1)                 # (bB, HWp)

    # Zero-pad along the flattened spatial axis so every conv tap is a plain
    # static lane slice; reads that fall outside the image see zeros.
    zpad = jnp.zeros((bB, MAXOFF), jnp.float32)
    avg_p = jnp.concatenate([zpad, avg, zpad], axis=-1)   # (bB, HWp + 2*MAXOFF)
    max_p = jnp.concatenate([zpad, mx, zpad], axis=-1)

    # Per-tap column-validity masks (depend only on dw); hoisted out of the
    # unrolled tap loop so the iota/compare work is done once.
    w_coord = jax.lax.broadcasted_iota(jnp.int32, (bB, HWp), 1) % W
    col_ok = [
        jnp.logical_and(w_coord + (dw - P) >= 0, w_coord + (dw - P) < W)
        for dw in range(K)
    ]

    # 2-input-channel K x K "same" convolution, fully unrolled (2*K*K taps).
    acc = jnp.zeros((bB, HWp), jnp.float32)
    for ic, src in enumerate((avg_p, max_p)):
        for dh in range(K):
            for dw in range(K):
                off = (dh - P) * W + (dw - P)
                tap = src[:, MAXOFF + off:MAXOFF + off + HWp]   # (bB, HWp)
                wgt = w_ref[ic * K * K + dh * K + dw]           # scalar (SMEM)
                acc = acc + wgt * jnp.where(col_ok[dw], tap, 0.0)

    attn = jax.nn.sigmoid(acc)                                  # (bB, HWp)
    o_ref[...] = (attn[:, None, :] * xf).astype(o_ref.dtype)


def _choose_block_b(B, C, HWp, itemsize):
    """Largest batch block that (a) keeps double-buffered in+out blocks well
    under default scoped-VMEM limits on v5e/v6e/v7x, (b) keeps >= 2 grid steps
    when B >= 2 (so both v7x TensorCores get work), (c) divides B."""
    per_b = C * HWp * max(itemsize, 4)       # kernel upcasts to f32 internally
    budget = 8 * 1024 * 1024                 # ~2 bufs x (in + out) blocks
    cap = max(1, budget // (4 * per_b))
    if B >= 2:
        cap = min(cap, B // 2)
    cap = int(max(1, min(cap, B)))
    bb = 1
    for d in range(1, cap + 1):
        if B % d == 0:
            bb = d
    return bb


def spatial_attention(x, w, *, block_b=None):
    """x: (B, C, H, W) NCHW.  w: Conv2d(2, 1, K, bias=False) weight,
    shape (1, 2, K, K) or (2, K, K)."""
    B, C, H, W = x.shape
    if w.ndim == 4:
        w = w[0]                                              # (2, K, K)
    K = int(w.shape[-1])
    HW = H * W
    HWp = ((HW + 127) // 128) * 128          # lane-dense invariant (pad if needed)

    x2 = x.reshape(B, C, HW)
    if HWp != HW:
        x2 = jnp.pad(x2, ((0, 0), (0, 0), (0, HWp - HW)))
    w_flat = w.reshape(2 * K * K).astype(jnp.float32)

    if block_b is None:
        block_b = _choose_block_b(B, C, HWp, x.dtype.itemsize)
    grid = B // block_b

    out = pl.pallas_call(
        functools.partial(_spatial_attention_kernel, W=W, K=K),
        out_shape=jax.ShapeDtypeStruct((B, C, HWp), x.dtype),
        grid_spec=pltpu.PrefetchScalarGridSpec(
            num_scalar_prefetch=0,
            grid=(grid,),
            in_specs=[
                pl.BlockSpec((block_b, C, HWp), lambda b: (b, 0, 0)),   # x slab
                pl.BlockSpec(memory_space=pltpu.MemorySpace.SMEM),      # conv weights
            ],
            out_specs=pl.BlockSpec((block_b, C, HWp), lambda b: (b, 0, 0)),
        ),
        compiler_params=pltpu.CompilerParams(
            dimension_semantics=("parallel",)),
    )(x2, w_flat)

    return out[:, :, :HW].reshape(B, C, H, W)


def spatial_attention_ref(x, w):
    # Pure-JAX reference matching the PyTorch module.
    if w.ndim == 3:
        w = w[None]
    avg = jnp.mean(x, axis=1, keepdims=True)                  # (B, 1, H, W)
    mx = jnp.max(x, axis=1, keepdims=True)                    # (B, 1, H, W)
    a = jnp.concatenate([avg, mx], axis=1)                    # (B, 2, H, W)
    conv = jax.lax.conv_general_dilated(
        a, w.astype(a.dtype), window_strides=(1, 1), padding="SAME",
        dimension_numbers=("NCHW", "OIHW", "NCHW"))           # (B, 1, H, W)
    return jax.nn.sigmoid(conv) * x


if __name__ == "__main__":
    B, C, H, W = 2, 4, 16, 16
    K = 5                                    # kernel_size in (3, 5, 7)

    key = jax.random.PRNGKey(0)
    kx, kw = jax.random.split(key)
    x = jax.random.normal(kx, (B, C, H, W), dtype=jnp.float32)
    # Conv2d(2, 1, 5, padding=2, bias=False) weight: (1, 2, 5, 5)
    w = jax.random.normal(kw, (1, 2, K, K), dtype=jnp.float32) * 0.1

    out = spatial_attention(x, w)
    out = jax.block_until_ready(out)

    ref = spatial_attention_ref(x, w)
    assert out.shape == (B, C, H, W)
    assert jnp.allclose(out, ref, atol=2e-5, rtol=1e-5), "mismatch vs reference"

    print("KERNEL_OK")
</pallas_src>

<mosaic_0001>
module attributes {stable_mosaic.version = 11 : i64} {
  func.func @_spatial_attention_kernel(%arg0: i32, %arg1: memref<1x4x256xf32, #tpu.memory_space<vmem>>, %arg2: memref<50xf32, #tpu.memory_space<smem>>, %arg3: memref<1x4x256xf32, #tpu.memory_space<vmem>>) attributes {dimension_semantics = [#tpu.dimension_semantics<parallel>], iteration_bounds = array<i64: 2>, scalar_prefetch = 0 : i64, scratch_operands = 0 : i64, tpu.core_type = #tpu.core_type<tc>, window_params = [{transform_indices = @transform_0, window_bounds = array<i64: 1, 4, 256>}, {transform_indices = @transform_1, window_bounds = array<i64: 50>}, {transform_indices = @transform_2, window_bounds = array<i64: 1, 4, 256>}]} {
    %c0 = arith.constant 0 : index
    %c0_0 = arith.constant 0 : index
    %c0_1 = arith.constant 0 : index
    %0 = vector.load %arg1[%c0, %c0_0, %c0_1] : memref<1x4x256xf32, #tpu.memory_space<vmem>>, vector<1x4x256xf32>
    %cst = arith.constant dense<0.000000e+00> : vector<1x256xf32>
    %1 = vector.multi_reduction <add>, %0, %cst [1] : vector<1x4x256xf32> to vector<1x256xf32>
    %cst_2 = arith.constant 4.000000e+00 : f32
    %2 = vector.broadcast %cst_2 : f32 to vector<1x256xf32>
    %3 = arith.divf %1, %2 : vector<1x256xf32>
    %cst_3 = arith.constant dense<0xFF800000> : vector<1x256xf32>
    %4 = vector.multi_reduction <maximumf>, %0, %cst_3 [1] : vector<1x4x256xf32> to vector<1x256xf32>
    %cst_4 = arith.constant 0.000000e+00 : f32
    %5 = vector.broadcast %cst_4 : f32 to vector<1x34xf32>
    %6 = tpu.concatenate %5, %3, %5 in 1 : vector<1x34xf32>, vector<1x256xf32>, vector<1x34xf32> -> vector<1x324xf32>
    %7 = tpu.concatenate %5, %4, %5 in 1 : vector<1x34xf32>, vector<1x256xf32>, vector<1x34xf32> -> vector<1x324xf32>
    %8 = tpu.iota {dimensions = array<i32: 1>} : vector<1x256xi32>
    %c16_i32 = arith.constant 16 : i32
    %c0_i32 = arith.constant 0 : i32
    %9 = arith.cmpi eq, %c16_i32, %c0_i32 : i32
    %c1_i32 = arith.constant 1 : i32
    %10 = arith.select %9, %c1_i32, %c16_i32 : i32
    %11 = vector.broadcast %10 : i32 to vector<1x256xi32>
    %12 = arith.remsi %8, %11 : vector<1x256xi32>
    %c0_i32_5 = arith.constant 0 : i32
    %13 = vector.broadcast %c0_i32_5 : i32 to vector<1x256xi32>
    %14 = arith.cmpi ne, %12, %13 : vector<1x256xi32>
    %c0_i32_6 = arith.constant 0 : i32
    %15 = vector.broadcast %c0_i32_6 : i32 to vector<1x256xi32>
    %16 = arith.cmpi slt, %12, %15 : vector<1x256xi32>
    %c0_i32_7 = arith.constant 0 : i32
    %17 = arith.cmpi slt, %10, %c0_i32_7 : i32
    %18 = vector.broadcast %17 : i1 to vector<1x256xi1>
    %19 = vector.broadcast %18 : vector<1x256xi1> to vector<1x256xi1>
    %20 = arith.xori %16, %19 : vector<1x256xi1>
    %21 = arith.andi %20, %14 : vector<1x256xi1>
    %22 = vector.broadcast %10 : i32 to vector<1x256xi32>
    %23 = arith.addi %12, %22 : vector<1x256xi32>
    %24 = arith.select %21, %23, %12 : vector<1x256xi1>, vector<1x256xi32>
    %c-2_i32 = arith.constant -2 : i32
    %25 = vector.broadcast %c-2_i32 : i32 to vector<1x256xi32>
    %26 = arith.addi %24, %25 : vector<1x256xi32>
    %c0_i32_8 = arith.constant 0 : i32
    %27 = vector.broadcast %c0_i32_8 : i32 to vector<1x256xi32>
    %28 = arith.cmpi sge, %26, %27 : vector<1x256xi32>
    %c-2_i32_9 = arith.constant -2 : i32
    %29 = vector.broadcast %c-2_i32_9 : i32 to vector<1x256xi32>
    %30 = arith.addi %24, %29 : vector<1x256xi32>
    %c16_i32_10 = arith.constant 16 : i32
    %31 = vector.broadcast %c16_i32_10 : i32 to vector<1x256xi32>
    %32 = arith.cmpi slt, %30, %31 : vector<1x256xi32>
    %33 = arith.andi %28, %32 : vector<1x256xi1>
    %c-1_i32 = arith.constant -1 : i32
    %34 = vector.broadcast %c-1_i32 : i32 to vector<1x256xi32>
    %35 = arith.addi %24, %34 : vector<1x256xi32>
    %c0_i32_11 = arith.constant 0 : i32
    %36 = vector.broadcast %c0_i32_11 : i32 to vector<1x256xi32>
    %37 = arith.cmpi sge, %35, %36 : vector<1x256xi32>
    %c-1_i32_12 = arith.constant -1 : i32
    %38 = vector.broadcast %c-1_i32_12 : i32 to vector<1x256xi32>
    %39 = arith.addi %24, %38 : vector<1x256xi32>
    %c16_i32_13 = arith.constant 16 : i32
    %40 = vector.broadcast %c16_i32_13 : i32 to vector<1x256xi32>
    %41 = arith.cmpi slt, %39, %40 : vector<1x256xi32>
    %42 = arith.andi %37, %41 : vector<1x256xi1>
    %c0_i32_14 = arith.constant 0 : i32
    %43 = vector.broadcast %c0_i32_14 : i32 to vector<1x256xi32>
    %44 = arith.addi %24, %43 : vector<1x256xi32>
    %c0_i32_15 = arith.constant 0 : i32
    %45 = vector.broadcast %c0_i32_15 : i32 to vector<1x256xi32>
    %46 = arith.cmpi sge, %44, %45 : vector<1x256xi32>
    %c0_i32_16 = arith.constant 0 : i32
    %47 = vector.broadcast %c0_i32_16 : i32 to vector<1x256xi32>
    %48 = arith.addi %24, %47 : vector<1x256xi32>
    %c16_i32_17 = arith.constant 16 : i32
    %49 = vector.broadcast %c16_i32_17 : i32 to vector<1x256xi32>
    %50 = arith.cmpi slt, %48, %49 : vector<1x256xi32>
    %51 = arith.andi %46, %50 : vector<1x256xi1>
    %c1_i32_18 = arith.constant 1 : i32
    %52 = vector.broadcast %c1_i32_18 : i32 to vector<1x256xi32>
    %53 = arith.addi %24, %52 : vector<1x256xi32>
    %c0_i32_19 = arith.constant 0 : i32
    %54 = vector.broadcast %c0_i32_19 : i32 to vector<1x256xi32>
    %55 = arith.cmpi sge, %53, %54 : vector<1x256xi32>
    %c1_i32_20 = arith.constant 1 : i32
    %56 = vector.broadcast %c1_i32_20 : i32 to vector<1x256xi32>
    %57 = arith.addi %24, %56 : vector<1x256xi32>
    %c16_i32_21 = arith.constant 16 : i32
    %58 = vector.broadcast %c16_i32_21 : i32 to vector<1x256xi32>
    %59 = arith.cmpi slt, %57, %58 : vector<1x256xi32>
    %60 = arith.andi %55, %59 : vector<1x256xi1>
    %c2_i32 = arith.constant 2 : i32
    %61 = vector.broadcast %c2_i32 : i32 to vector<1x256xi32>
    %62 = arith.addi %24, %61 : vector<1x256xi32>
    %c0_i32_22 = arith.constant 0 : i32
    %63 = vector.broadcast %c0_i32_22 : i32 to vector<1x256xi32>
    %64 = arith.cmpi sge, %62, %63 : vector<1x256xi32>
    %c2_i32_23 = arith.constant 2 : i32
    %65 = vector.broadcast %c2_i32_23 : i32 to vector<1x256xi32>
    %66 = arith.addi %24, %65 : vector<1x256xi32>
    %c16_i32_24 = arith.constant 16 : i32
    %67 = vector.broadcast %c16_i32_24 : i32 to vector<1x256xi32>
    %68 = arith.cmpi slt, %66, %67 : vector<1x256xi32>
    %69 = arith.andi %64, %68 : vector<1x256xi1>
    %cst_25 = arith.constant 0.000000e+00 : f32
    %70 = vector.broadcast %cst_25 : f32 to vector<1x256xf32>
    %71 = vector.extract_strided_slice %6 {offsets = [0, 0], sizes = [1, 256], strides = [1, 1]} : vector<1x324xf32> to vector<1x256xf32>
    %c0_26 = arith.constant 0 : index
    %72 = memref.load %arg2[%c0_26] : memref<50xf32, #tpu.memory_space<smem>>
    %cst_27 = arith.constant 0.000000e+00 : f32
    %73 = vector.broadcast %cst_27 : f32 to vector<1x256xf32>
    %74 = arith.select %33, %71, %73 : vector<1x256xi1>, vector<1x256xf32>
    %75 = vector.broadcast %72 : f32 to vector<1x256xf32>
    %76 = arith.mulf %75, %74 : vector<1x256xf32>
    %77 = arith.addf %70, %76 : vector<1x256xf32>
    %78 = vector.extract_strided_slice %6 {offsets = [0, 1], sizes = [1, 256], strides = [1, 1]} : vector<1x324xf32> to vector<1x256xf32>
    %c1 = arith.constant 1 : index
    %79 = memref.load %arg2[%c1] : memref<50xf32, #tpu.memory_space<smem>>
    %cst_28 = arith.constant 0.000000e+00 : f32
    %80 = vector.broadcast %cst_28 : f32 to vector<1x256xf32>
    %81 = arith.select %42, %78, %80 : vector<1x256xi1>, vector<1x256xf32>
    %82 = vector.broadcast %79 : f32 to vector<1x256xf32>
    %83 = arith.mulf %82, %81 : vector<1x256xf32>
    %84 = arith.addf %77, %83 : vector<1x256xf32>
    %85 = vector.extract_strided_slice %6 {offsets = [0, 2], sizes = [1, 256], strides = [1, 1]} : vector<1x324xf32> to vector<1x256xf32>
    %c2 = arith.constant 2 : index
    %86 = memref.load %arg2[%c2] : memref<50xf32, #tpu.memory_space<smem>>
    %cst_29 = arith.constant 0.000000e+00 : f32
    %87 = vector.broadcast %cst_29 : f32 to vector<1x256xf32>
    %88 = arith.select %51, %85, %87 : vector<1x256xi1>, vector<1x256xf32>
    %89 = vector.broadcast %86 : f32 to vector<1x256xf32>
    %90 = arith.mulf %89, %88 : vector<1x256xf32>
    %91 = arith.addf %84, %90 : vector<1x256xf32>
    %92 = vector.extract_strided_slice %6 {offsets = [0, 3], sizes = [1, 256], strides = [1, 1]} : vector<1x324xf32> to vector<1x256xf32>
    %c3 = arith.constant 3 : index
    %93 = memref.load %arg2[%c3] : memref<50xf32, #tpu.memory_space<smem>>
    %cst_30 = arith.constant 0.000000e+00 : f32
    %94 = vector.broadcast %cst_30 : f32 to vector<1x256xf32>
    %95 = arith.select %60, %92, %94 : vector<1x256xi1>, vector<1x256xf32>
    %96 = vector.broadcast %93 : f32 to vector<1x256xf32>
    %97 = arith.mulf %96, %95 : vector<1x256xf32>
    %98 = arith.addf %91, %97 : vector<1x256xf32>
    %99 = vector.extract_strided_slice %6 {offsets = [0, 4], sizes = [1, 256], strides = [1, 1]} : vector<1x324xf32> to vector<1x256xf32>
    %c4 = arith.constant 4 : index
    %100 = memref.load %arg2[%c4] : memref<50xf32, #tpu.memory_space<smem>>
    %cst_31 = arith.constant 0.000000e+00 : f32
    %101 = vector.broadcast %cst_31 : f32 to vector<1x256xf32>
    %102 = arith.select %69, %99, %101 : vector<1x256xi1>, vector<1x256xf32>
    %103 = vector.broadcast %100 : f32 to vector<1x256xf32>
    %104 = arith.mulf %103, %102 : vector<1x256xf32>
    %105 = arith.addf %98, %104 : vector<1x256xf32>
    %106 = vector.extract_strided_slice %6 {offsets = [0, 16], sizes = [1, 256], strides = [1, 1]} : vector<1x324xf32> to vector<1x256xf32>
    %c5 = arith.constant 5 : index
    %107 = memref.load %arg2[%c5] : memref<50xf32, #tpu.memory_space<smem>>
    %cst_32 = arith.constant 0.000000e+00 : f32
    %108 = vector.broadcast %cst_32 : f32 to vector<1x256xf32>
    %109 = arith.select %33, %106, %108 : vector<1x256xi1>, vector<1x256xf32>
    %110 = vector.broadcast %107 : f32 to vector<1x256xf32>
    %111 = arith.mulf %110, %109 : vector<1x256xf32>
    %112 = arith.addf %105, %111 : vector<1x256xf32>
    %113 = vector.extract_strided_slice %6 {offsets = [0, 17], sizes = [1, 256], strides = [1, 1]} : vector<1x324xf32> to vector<1x256xf32>
    %c6 = arith.constant 6 : index
    %114 = memref.load %arg2[%c6] : memref<50xf32, #tpu.memory_space<smem>>
    %cst_33 = arith.constant 0.000000e+00 : f32
    %115 = vector.broadcast %cst_33 : f32 to vector<1x256xf32>
    %116 = arith.select %42, %113, %115 : vector<1x256xi1>, vector<1x256xf32>
    %117 = vector.broadcast %114 : f32 to vector<1x256xf32>
    %118 = arith.mulf %117, %116 : vector<1x256xf32>
    %119 = arith.addf %112, %118 : vector<1x256xf32>
    %120 = vector.extract_strided_slice %6 {offsets = [0, 18], sizes = [1, 256], strides = [1, 1]} : vector<1x324xf32> to vector<1x256xf32>
    %c7 = arith.constant 7 : index
    %121 = memref.load %arg2[%c7] : memref<50xf32, #tpu.memory_space<smem>>
    %cst_34 = arith.constant 0.000000e+00 : f32
    %122 = vector.broadcast %cst_34 : f32 to vector<1x256xf32>
    %123 = arith.select %51, %120, %122 : vector<1x256xi1>, vector<1x256xf32>
    %124 = vector.broadcast %121 : f32 to vector<1x256xf32>
    %125 = arith.mulf %124, %123 : vector<1x256xf32>
    %126 = arith.addf %119, %125 : vector<1x256xf32>
    %127 = vector.extract_strided_slice %6 {offsets = [0, 19], sizes = [1, 256], strides = [1, 1]} : vector<1x324xf32> to vector<1x256xf32>
    %c8 = arith.constant 8 : index
    %128 = memref.load %arg2[%c8] : memref<50xf32, #tpu.memory_space<smem>>
    %cst_35 = arith.constant 0.000000e+00 : f32
    %129 = vector.broadcast %cst_35 : f32 to vector<1x256xf32>
    %130 = arith.select %60, %127, %129 : vector<1x256xi1>, vector<1x256xf32>
    %131 = vector.broadcast %128 : f32 to vector<1x256xf32>
    %132 = arith.mulf %131, %130 : vector<1x256xf32>
    %133 = arith.addf %126, %132 : vector<1x256xf32>
    %134 = vector.extract_strided_slice %6 {offsets = [0, 20], sizes = [1, 256], strides = [1, 1]} : vector<1x324xf32> to vector<1x256xf32>
    %c9 = arith.constant 9 : index
    %135 = memref.load %arg2[%c9] : memref<50xf32, #tpu.memory_space<smem>>
    %cst_36 = arith.constant 0.000000e+00 : f32
    %136 = vector.broadcast %cst_36 : f32 to vector<1x256xf32>
    %137 = arith.select %69, %134, %136 : vector<1x256xi1>, vector<1x256xf32>
    %138 = vector.broadcast %135 : f32 to vector<1x256xf32>
    %139 = arith.mulf %138, %137 : vector<1x256xf32>
    %140 = arith.addf %133, %139 : vector<1x256xf32>
    %141 = vector.extract_strided_slice %6 {offsets = [0, 32], sizes = [1, 256], strides = [1, 1]} : vector<1x324xf32> to vector<1x256xf32>
    %c10 = arith.constant 10 : index
    %142 = memref.load %arg2[%c10] : memref<50xf32, #tpu.memory_space<smem>>
    %cst_37 = arith.constant 0.000000e+00 : f32
    %143 = vector.broadcast %cst_37 : f32 to vector<1x256xf32>
    %144 = arith.select %33, %141, %143 : vector<1x256xi1>, vector<1x256xf32>
    %145 = vector.broadcast %142 : f32 to vector<1x256xf32>
    %146 = arith.mulf %145, %144 : vector<1x256xf32>
    %147 = arith.addf %140, %146 : vector<1x256xf32>
    %148 = vector.extract_strided_slice %6 {offsets = [0, 33], sizes = [1, 256], strides = [1, 1]} : vector<1x324xf32> to vector<1x256xf32>
    %c11 = arith.constant 11 : index
    %149 = memref.load %arg2[%c11] : memref<50xf32, #tpu.memory_space<smem>>
    %cst_38 = arith.constant 0.000000e+00 : f32
    %150 = vector.broadcast %cst_38 : f32 to vector<1x256xf32>
    %151 = arith.select %42, %148, %150 : vector<1x256xi1>, vector<1x256xf32>
    %152 = vector.broadcast %149 : f32 to vector<1x256xf32>
    %153 = arith.mulf %152, %151 : vector<1x256xf32>
    %154 = arith.addf %147, %153 : vector<1x256xf32>
    %155 = vector.extract_strided_slice %6 {offsets = [0, 34], sizes = [1, 256], strides = [1, 1]} : vector<1x324xf32> to vector<1x256xf32>
    %c12 = arith.constant 12 : index
    %156 = memref.load %arg2[%c12] : memref<50xf32, #tpu.memory_space<smem>>
    %cst_39 = arith.constant 0.000000e+00 : f32
    %157 = vector.broadcast %cst_39 : f32 to vector<1x256xf32>
    %158 = arith.select %51, %155, %157 : vector<1x256xi1>, vector<1x256xf32>
    %159 = vector.broadcast %156 : f32 to vector<1x256xf32>
    %160 = arith.mulf %159, %158 : vector<1x256xf32>
    %161 = arith.addf %154, %160 : vector<1x256xf32>
    %162 = vector.extract_strided_slice %6 {offsets = [0, 35], sizes = [1, 256], strides = [1, 1]} : vector<1x324xf32> to vector<1x256xf32>
    %c13 = arith.constant 13 : index
    %163 = memref.load %arg2[%c13] : memref<50xf32, #tpu.memory_space<smem>>
    %cst_40 = arith.constant 0.000000e+00 : f32
    %164 = vector.broadcast %cst_40 : f32 to vector<1x256xf32>
    %165 = arith.select %60, %162, %164 : vector<1x256xi1>, vector<1x256xf32>
    %166 = vector.broadcast %163 : f32 to vector<1x256xf32>
    %167 = arith.mulf %166, %165 : vector<1x256xf32>
    %168 = arith.addf %161, %167 : vector<1x256xf32>
    %169 = vector.extract_strided_slice %6 {offsets = [0, 36], sizes = [1, 256], strides = [1, 1]} : vector<1x324xf32> to vector<1x256xf32>
    %c14 = arith.constant 14 : index
    %170 = memref.load %arg2[%c14] : memref<50xf32, #tpu.memory_space<smem>>
    %cst_41 = arith.constant 0.000000e+00 : f32
    %171 = vector.broadcast %cst_41 : f32 to vector<1x256xf32>
    %172 = arith.select %69, %169, %171 : vector<1x256xi1>, vector<1x256xf32>
    %173 = vector.broadcast %170 : f32 to vector<1x256xf32>
    %174 = arith.mulf %173, %172 : vector<1x256xf32>
    %175 = arith.addf %168, %174 : vector<1x256xf32>
    %176 = vector.extract_strided_slice %6 {offsets = [0, 48], sizes = [1, 256], strides = [1, 1]} : vector<1x324xf32> to vector<1x256xf32>
    %c15 = arith.constant 15 : index
    %177 = memref.load %arg2[%c15] : memref<50xf32, #tpu.memory_space<smem>>
    %cst_42 = arith.constant 0.000000e+00 : f32
    %178 = vector.broadcast %cst_42 : f32 to vector<1x256xf32>
    %179 = arith.select %33, %176, %178 : vector<1x256xi1>, vector<1x256xf32>
    %180 = vector.broadcast %177 : f32 to vector<1x256xf32>
    %181 = arith.mulf %180, %179 : vector<1x256xf32>
    %182 = arith.addf %175, %181 : vector<1x256xf32>
    %183 = vector.extract_strided_slice %6 {offsets = [0, 49], sizes = [1, 256], strides = [1, 1]} : vector<1x324xf32> to vector<1x256xf32>
    %c16 = arith.constant 16 : index
    %184 = memref.load %arg2[%c16] : memref<50xf32, #tpu.memory_space<smem>>
    %cst_43 = arith.constant 0.000000e+00 : f32
    %185 = vector.broadcast %cst_43 : f32 to vector<1x256xf32>
    %186 = arith.select %42, %183, %185 : vector<1x256xi1>, vector<1x256xf32>
    %187 = vector.broadcast %184 : f32 to vector<1x256xf32>
    %188 = arith.mulf %187, %186 : vector<1x256xf32>
    %189 = arith.addf %182, %188 : vector<1x256xf32>
    %190 = vector.extract_strided_slice %6 {offsets = [0, 50], sizes = [1, 256], strides = [1, 1]} : vector<1x324xf32> to vector<1x256xf32>
    %c17 = arith.constant 17 : index
    %191 = memref.load %arg2[%c17] : memref<50xf32, #tpu.memory_space<smem>>
    %cst_44 = arith.constant 0.000000e+00 : f32
    %192 = vector.broadcast %cst_44 : f32 to vector<1x256xf32>
    %193 = arith.select %51, %190, %192 : vector<1x256xi1>, vector<1x256xf32>
    %194 = vector.broadcast %191 : f32 to vector<1x256xf32>
    %195 = arith.mulf %194, %193 : vector<1x256xf32>
    %196 = arith.addf %189, %195 : vector<1x256xf32>
    %197 = vector.extract_strided_slice %6 {offsets = [0, 51], sizes = [1, 256], strides = [1, 1]} : vector<1x324xf32> to vector<1x256xf32>
    %c18 = arith.constant 18 : index
    %198 = memref.load %arg2[%c18] : memref<50xf32, #tpu.memory_space<smem>>
    %cst_45 = arith.constant 0.000000e+00 : f32
    %199 = vector.broadcast %cst_45 : f32 to vector<1x256xf32>
    %200 = arith.select %60, %197, %199 : vector<1x256xi1>, vector<1x256xf32>
    %201 = vector.broadcast %198 : f32 to vector<1x256xf32>
    %202 = arith.mulf %201, %200 : vector<1x256xf32>
    %203 = arith.addf %196, %202 : vector<1x256xf32>
    %204 = vector.extract_strided_slice %6 {offsets = [0, 52], sizes = [1, 256], strides = [1, 1]} : vector<1x324xf32> to vector<1x256xf32>
    %c19 = arith.constant 19 : index
    %205 = memref.load %arg2[%c19] : memref<50xf32, #tpu.memory_space<smem>>
    %cst_46 = arith.constant 0.000000e+00 : f32
    %206 = vector.broadcast %cst_46 : f32 to vector<1x256xf32>
    %207 = arith.select %69, %204, %206 : vector<1x256xi1>, vector<1x256xf32>
    %208 = vector.broadcast %205 : f32 to vector<1x256xf32>
    %209 = arith.mulf %208, %207 : vector<1x256xf32>
    %210 = arith.addf %203, %209 : vector<1x256xf32>
    %211 = vector.extract_strided_slice %6 {offsets = [0, 64], sizes = [1, 256], strides = [1, 1]} : vector<1x324xf32> to vector<1x256xf32>
    %c20 = arith.constant 20 : index
    %212 = memref.load %arg2[%c20] : memref<50xf32, #tpu.memory_space<smem>>
    %cst_47 = arith.constant 0.000000e+00 : f32
    %213 = vector.broadcast %cst_47 : f32 to vector<1x256xf32>
    %214 = arith.select %33, %211, %213 : vector<1x256xi1>, vector<1x256xf32>
    %215 = vector.broadcast %212 : f32 to vector<1x256xf32>
    %216 = arith.mulf %215, %214 : vector<1x256xf32>
    %217 = arith.addf %210, %216 : vector<1x256xf32>
    %218 = vector.extract_strided_slice %6 {offsets = [0, 65], sizes = [1, 256], strides = [1, 1]} : vector<1x324xf32> to vector<1x256xf32>
    %c21 = arith.constant 21 : index
    %219 = memref.load %arg2[%c21] : memref<50xf32, #tpu.memory_space<smem>>
    %cst_48 = arith.constant 0.000000e+00 : f32
    %220 = vector.broadcast %cst_48 : f32 to vector<1x256xf32>
    %221 = arith.select %42, %218, %220 : vector<1x256xi1>, vector<1x256xf32>
    %222 = vector.broadcast %219 : f32 to vector<1x256xf32>
    %223 = arith.mulf %222, %221 : vector<1x256xf32>
    %224 = arith.addf %217, %223 : vector<1x256xf32>
    %225 = vector.extract_strided_slice %6 {offsets = [0, 66], sizes = [1, 256], strides = [1, 1]} : vector<1x324xf32> to vector<1x256xf32>
    %c22 = arith.constant 22 : index
    %226 = memref.load %arg2[%c22] : memref<50xf32, #tpu.memory_space<smem>>
    %cst_49 = arith.constant 0.000000e+00 : f32
    %227 = vector.broadcast %cst_49 : f32 to vector<1x256xf32>
    %228 = arith.select %51, %225, %227 : vector<1x256xi1>, vector<1x256xf32>
    %229 = vector.broadcast %226 : f32 to vector<1x256xf32>
    %230 = arith.mulf %229, %228 : vector<1x256xf32>
    %231 = arith.addf %224, %230 : vector<1x256xf32>
    %232 = vector.extract_strided_slice %6 {offsets = [0, 67], sizes = [1, 256], strides = [1, 1]} : vector<1x324xf32> to vector<1x256xf32>
    %c23 = arith.constant 23 : index
    %233 = memref.load %arg2[%c23] : memref<50xf32, #tpu.memory_space<smem>>
    %cst_50 = arith.constant 0.000000e+00 : f32
    %234 = vector.broadcast %cst_50 : f32 to vector<1x256xf32>
    %235 = arith.select %60, %232, %234 : vector<1x256xi1>, vector<1x256xf32>
    %236 = vector.broadcast %233 : f32 to vector<1x256xf32>
    %237 = arith.mulf %236, %235 : vector<1x256xf32>
    %238 = arith.addf %231, %237 : vector<1x256xf32>
    %239 = vector.extract_strided_slice %6 {offsets = [0, 68], sizes = [1, 256], strides = [1, 1]} : vector<1x324xf32> to vector<1x256xf32>
    %c24 = arith.constant 24 : index
    %240 = memref.load %arg2[%c24] : memref<50xf32, #tpu.memory_space<smem>>
    %cst_51 = arith.constant 0.000000e+00 : f32
    %241 = vector.broadcast %cst_51 : f32 to vector<1x256xf32>
    %242 = arith.select %69, %239, %241 : vector<1x256xi1>, vector<1x256xf32>
    %243 = vector.broadcast %240 : f32 to vector<1x256xf32>
    %244 = arith.mulf %243, %242 : vector<1x256xf32>
    %245 = arith.addf %238, %244 : vector<1x256xf32>
    %246 = vector.extract_strided_slice %7 {offsets = [0, 0], sizes = [1, 256], strides = [1, 1]} : vector<1x324xf32> to vector<1x256xf32>
    %c25 = arith.constant 25 : index
    %247 = memref.load %arg2[%c25] : memref<50xf32, #tpu.memory_space<smem>>
    %cst_52 = arith.constant 0.000000e+00 : f32
    %248 = vector.broadcast %cst_52 : f32 to vector<1x256xf32>
    %249 = arith.select %33, %246, %248 : vector<1x256xi1>, vector<1x256xf32>
    %250 = vector.broadcast %247 : f32 to vector<1x256xf32>
    %251 = arith.mulf %250, %249 : vector<1x256xf32>
    %252 = arith.addf %245, %251 : vector<1x256xf32>
    %253 = vector.extract_strided_slice %7 {offsets = [0, 1], sizes = [1, 256], strides = [1, 1]} : vector<1x324xf32> to vector<1x256xf32>
    %c26 = arith.constant 26 : index
    %254 = memref.load %arg2[%c26] : memref<50xf32, #tpu.memory_space<smem>>
    %cst_53 = arith.constant 0.000000e+00 : f32
    %255 = vector.broadcast %cst_53 : f32 to vector<1x256xf32>
    %256 = arith.select %42, %253, %255 : vector<1x256xi1>, vector<1x256xf32>
    %257 = vector.broadcast %254 : f32 to vector<1x256xf32>
    %258 = arith.mulf %257, %256 : vector<1x256xf32>
    %259 = arith.addf %252, %258 : vector<1x256xf32>
    %260 = vector.extract_strided_slice %7 {offsets = [0, 2], sizes = [1, 256], strides = [1, 1]} : vector<1x324xf32> to vector<1x256xf32>
    %c27 = arith.constant 27 : index
    %261 = memref.load %arg2[%c27] : memref<50xf32, #tpu.memory_space<smem>>
    %cst_54 = arith.constant 0.000000e+00 : f32
    %262 = vector.broadcast %cst_54 : f32 to vector<1x256xf32>
    %263 = arith.select %51, %260, %262 : vector<1x256xi1>, vector<1x256xf32>
    %264 = vector.broadcast %261 : f32 to vector<1x256xf32>
    %265 = arith.mulf %264, %263 : vector<1x256xf32>
    %266 = arith.addf %259, %265 : vector<1x256xf32>
    %267 = vector.extract_strided_slice %7 {offsets = [0, 3], sizes = [1, 256], strides = [1, 1]} : vector<1x324xf32> to vector<1x256xf32>
    %c28 = arith.constant 28 : index
    %268 = memref.load %arg2[%c28] : memref<50xf32, #tpu.memory_space<smem>>
    %cst_55 = arith.constant 0.000000e+00 : f32
    %269 = vector.broadcast %cst_55 : f32 to vector<1x256xf32>
    %270 = arith.select %60, %267, %269 : vector<1x256xi1>, vector<1x256xf32>
    %271 = vector.broadcast %268 : f32 to vector<1x256xf32>
    %272 = arith.mulf %271, %270 : vector<1x256xf32>
    %273 = arith.addf %266, %272 : vector<1x256xf32>
    %274 = vector.extract_strided_slice %7 {offsets = [0, 4], sizes = [1, 256], strides = [1, 1]} : vector<1x324xf32> to vector<1x256xf32>
    %c29 = arith.constant 29 : index
    %275 = memref.load %arg2[%c29] : memref<50xf32, #tpu.memory_space<smem>>
    %cst_56 = arith.constant 0.000000e+00 : f32
    %276 = vector.broadcast %cst_56 : f32 to vector<1x256xf32>
    %277 = arith.select %69, %274, %276 : vector<1x256xi1>, vector<1x256xf32>
    %278 = vector.broadcast %275 : f32 to vector<1x256xf32>
    %279 = arith.mulf %278, %277 : vector<1x256xf32>
    %280 = arith.addf %273, %279 : vector<1x256xf32>
    %281 = vector.extract_strided_slice %7 {offsets = [0, 16], sizes = [1, 256], strides = [1, 1]} : vector<1x324xf32> to vector<1x256xf32>
    %c30 = arith.constant 30 : index
    %282 = memref.load %arg2[%c30] : memref<50xf32, #tpu.memory_space<smem>>
    %cst_57 = arith.constant 0.000000e+00 : f32
    %283 = vector.broadcast %cst_57 : f32 to vector<1x256xf32>
    %284 = arith.select %33, %281, %283 : vector<1x256xi1>, vector<1x256xf32>
    %285 = vector.broadcast %282 : f32 to vector<1x256xf32>
    %286 = arith.mulf %285, %284 : vector<1x256xf32>
    %287 = arith.addf %280, %286 : vector<1x256xf32>
    %288 = vector.extract_strided_slice %7 {offsets = [0, 17], sizes = [1, 256], strides = [1, 1]} : vector<1x324xf32> to vector<1x256xf32>
    %c31 = arith.constant 31 : index
    %289 = memref.load %arg2[%c31] : memref<50xf32, #tpu.memory_space<smem>>
    %cst_58 = arith.constant 0.000000e+00 : f32
    %290 = vector.broadcast %cst_58 : f32 to vector<1x256xf32>
    %291 = arith.select %42, %288, %290 : vector<1x256xi1>, vector<1x256xf32>
    %292 = vector.broadcast %289 : f32 to vector<1x256xf32>
    %293 = arith.mulf %292, %291 : vector<1x256xf32>
    %294 = arith.addf %287, %293 : vector<1x256xf32>
    %295 = vector.extract_strided_slice %7 {offsets = [0, 18], sizes = [1, 256], strides = [1, 1]} : vector<1x324xf32> to vector<1x256xf32>
    %c32 = arith.constant 32 : index
    %296 = memref.load %arg2[%c32] : memref<50xf32, #tpu.memory_space<smem>>
    %cst_59 = arith.constant 0.000000e+00 : f32
    %297 = vector.broadcast %cst_59 : f32 to vector<1x256xf32>
    %298 = arith.select %51, %295, %297 : vector<1x256xi1>, vector<1x256xf32>
    %299 = vector.broadcast %296 : f32 to vector<1x256xf32>
    %300 = arith.mulf %299, %298 : vector<1x256xf32>
    %301 = arith.addf %294, %300 : vector<1x256xf32>
    %302 = vector.extract_strided_slice %7 {offsets = [0, 19], sizes = [1, 256], strides = [1, 1]} : vector<1x324xf32> to vector<1x256xf32>
    %c33 = arith.constant 33 : index
    %303 = memref.load %arg2[%c33] : memref<50xf32, #tpu.memory_space<smem>>
    %cst_60 = arith.constant 0.000000e+00 : f32
    %304 = vector.broadcast %cst_60 : f32 to vector<1x256xf32>
    %305 = arith.select %60, %302, %304 : vector<1x256xi1>, vector<1x256xf32>
    %306 = vector.broadcast %303 : f32 to vector<1x256xf32>
    %307 = arith.mulf %306, %305 : vector<1x256xf32>
    %308 = arith.addf %301, %307 : vector<1x256xf32>
    %309 = vector.extract_strided_slice %7 {offsets = [0, 20], sizes = [1, 256], strides = [1, 1]} : vector<1x324xf32> to vector<1x256xf32>
    %c34 = arith.constant 34 : index
    %310 = memref.load %arg2[%c34] : memref<50xf32, #tpu.memory_space<smem>>
    %cst_61 = arith.constant 0.000000e+00 : f32
    %311 = vector.broadcast %cst_61 : f32 to vector<1x256xf32>
    %312 = arith.select %69, %309, %311 : vector<1x256xi1>, vector<1x256xf32>
    %313 = vector.broadcast %310 : f32 to vector<1x256xf32>
    %314 = arith.mulf %313, %312 : vector<1x256xf32>
    %315 = arith.addf %308, %314 : vector<1x256xf32>
    %316 = vector.extract_strided_slice %7 {offsets = [0, 32], sizes = [1, 256], strides = [1, 1]} : vector<1x324xf32> to vector<1x256xf32>
    %c35 = arith.constant 35 : index
    %317 = memref.load %arg2[%c35] : memref<50xf32, #tpu.memory_space<smem>>
    %cst_62 = arith.constant 0.000000e+00 : f32
    %318 = vector.broadcast %cst_62 : f32 to vector<1x256xf32>
    %319 = arith.select %33, %316, %318 : vector<1x256xi1>, vector<1x256xf32>
    %320 = vector.broadcast %317 : f32 to vector<1x256xf32>
    %321 = arith.mulf %320, %319 : vector<1x256xf32>
    %322 = arith.addf %315, %321 : vector<1x256xf32>
    %323 = vector.extract_strided_slice %7 {offsets = [0, 33], sizes = [1, 256], strides = [1, 1]} : vector<1x324xf32> to vector<1x256xf32>
    %c36 = arith.constant 36 : index
    %324 = memref.load %arg2[%c36] : memref<50xf32, #tpu.memory_space<smem>>
    %cst_63 = arith.constant 0.000000e+00 : f32
    %325 = vector.broadcast %cst_63 : f32 to vector<1x256xf32>
    %326 = arith.select %42, %323, %325 : vector<1x256xi1>, vector<1x256xf32>
    %327 = vector.broadcast %324 : f32 to vector<1x256xf32>
    %328 = arith.mulf %327, %326 : vector<1x256xf32>
    %329 = arith.addf %322, %328 : vector<1x256xf32>
    %330 = vector.extract_strided_slice %7 {offsets = [0, 34], sizes = [1, 256], strides = [1, 1]} : vector<1x324xf32> to vector<1x256xf32>
    %c37 = arith.constant 37 : index
    %331 = memref.load %arg2[%c37] : memref<50xf32, #tpu.memory_space<smem>>
    %cst_64 = arith.constant 0.000000e+00 : f32
    %332 = vector.broadcast %cst_64 : f32 to vector<1x256xf32>
    %333 = arith.select %51, %330, %332 : vector<1x256xi1>, vector<1x256xf32>
    %334 = vector.broadcast %331 : f32 to vector<1x256xf32>
    %335 = arith.mulf %334, %333 : vector<1x256xf32>
    %336 = arith.addf %329, %335 : vector<1x256xf32>
    %337 = vector.extract_strided_slice %7 {offsets = [0, 35], sizes = [1, 256], strides = [1, 1]} : vector<1x324xf32> to vector<1x256xf32>
    %c38 = arith.constant 38 : index
    %338 = memref.load %arg2[%c38] : memref<50xf32, #tpu.memory_space<smem>>
    %cst_65 = arith.constant 0.000000e+00 : f32
    %339 = vector.broadcast %cst_65 : f32 to vector<1x256xf32>
    %340 = arith.select %60, %337, %339 : vector<1x256xi1>, vector<1x256xf32>
    %341 = vector.broadcast %338 : f32 to vector<1x256xf32>
    %342 = arith.mulf %341, %340 : vector<1x256xf32>
    %343 = arith.addf %336, %342 : vector<1x256xf32>
    %344 = vector.extract_strided_slice %7 {offsets = [0, 36], sizes = [1, 256], strides = [1, 1]} : vector<1x324xf32> to vector<1x256xf32>
    %c39 = arith.constant 39 : index
    %345 = memref.load %arg2[%c39] : memref<50xf32, #tpu.memory_space<smem>>
    %cst_66 = arith.constant 0.000000e+00 : f32
    %346 = vector.broadcast %cst_66 : f32 to vector<1x256xf32>
    %347 = arith.select %69, %344, %346 : vector<1x256xi1>, vector<1x256xf32>
    %348 = vector.broadcast %345 : f32 to vector<1x256xf32>
    %349 = arith.mulf %348, %347 : vector<1x256xf32>
    %350 = arith.addf %343, %349 : vector<1x256xf32>
    %351 = vector.extract_strided_slice %7 {offsets = [0, 48], sizes = [1, 256], strides = [1, 1]} : vector<1x324xf32> to vector<1x256xf32>
    %c40 = arith.constant 40 : index
    %352 = memref.load %arg2[%c40] : memref<50xf32, #tpu.memory_space<smem>>
    %cst_67 = arith.constant 0.000000e+00 : f32
    %353 = vector.broadcast %cst_67 : f32 to vector<1x256xf32>
    %354 = arith.select %33, %351, %353 : vector<1x256xi1>, vector<1x256xf32>
    %355 = vector.broadcast %352 : f32 to vector<1x256xf32>
    %356 = arith.mulf %355, %354 : vector<1x256xf32>
    %357 = arith.addf %350, %356 : vector<1x256xf32>
    %358 = vector.extract_strided_slice %7 {offsets = [0, 49], sizes = [1, 256], strides = [1, 1]} : vector<1x324xf32> to vector<1x256xf32>
    %c41 = arith.constant 41 : index
    %359 = memref.load %arg2[%c41] : memref<50xf32, #tpu.memory_space<smem>>
    %cst_68 = arith.constant 0.000000e+00 : f32
    %360 = vector.broadcast %cst_68 : f32 to vector<1x256xf32>
    %361 = arith.select %42, %358, %360 : vector<1x256xi1>, vector<1x256xf32>
    %362 = vector.broadcast %359 : f32 to vector<1x256xf32>
    %363 = arith.mulf %362, %361 : vector<1x256xf32>
    %364 = arith.addf %357, %363 : vector<1x256xf32>
    %365 = vector.extract_strided_slice %7 {offsets = [0, 50], sizes = [1, 256], strides = [1, 1]} : vector<1x324xf32> to vector<1x256xf32>
    %c42 = arith.constant 42 : index
    %366 = memref.load %arg2[%c42] : memref<50xf32, #tpu.memory_space<smem>>
    %cst_69 = arith.constant 0.000000e+00 : f32
    %367 = vector.broadcast %cst_69 : f32 to vector<1x256xf32>
    %368 = arith.select %51, %365, %367 : vector<1x256xi1>, vector<1x256xf32>
    %369 = vector.broadcast %366 : f32 to vector<1x256xf32>
    %370 = arith.mulf %369, %368 : vector<1x256xf32>
    %371 = arith.addf %364, %370 : vector<1x256xf32>
    %372 = vector.extract_strided_slice %7 {offsets = [0, 51], sizes = [1, 256], strides = [1, 1]} : vector<1x324xf32> to vector<1x256xf32>
    %c43 = arith.constant 43 : index
    %373 = memref.load %arg2[%c43] : memref<50xf32, #tpu.memory_space<smem>>
    %cst_70 = arith.constant 0.000000e+00 : f32
    %374 = vector.broadcast %cst_70 : f32 to vector<1x256xf32>
    %375 = arith.select %60, %372, %374 : vector<1x256xi1>, vector<1x256xf32>
    %376 = vector.broadcast %373 : f32 to vector<1x256xf32>
    %377 = arith.mulf %376, %375 : vector<1x256xf32>
    %378 = arith.addf %371, %377 : vector<1x256xf32>
    %379 = vector.extract_strided_slice %7 {offsets = [0, 52], sizes = [1, 256], strides = [1, 1]} : vector<1x324xf32> to vector<1x256xf32>
    %c44 = arith.constant 44 : index
    %380 = memref.load %arg2[%c44] : memref<50xf32, #tpu.memory_space<smem>>
    %cst_71 = arith.constant 0.000000e+00 : f32
    %381 = vector.broadcast %cst_71 : f32 to vector<1x256xf32>
    %382 = arith.select %69, %379, %381 : vector<1x256xi1>, vector<1x256xf32>
    %383 = vector.broadcast %380 : f32 to vector<1x256xf32>
    %384 = arith.mulf %383, %382 : vector<1x256xf32>
    %385 = arith.addf %378, %384 : vector<1x256xf32>
    %386 = vector.extract_strided_slice %7 {offsets = [0, 64], sizes = [1, 256], strides = [1, 1]} : vector<1x324xf32> to vector<1x256xf32>
    %c45 = arith.constant 45 : index
    %387 = memref.load %arg2[%c45] : memref<50xf32, #tpu.memory_space<smem>>
    %cst_72 = arith.constant 0.000000e+00 : f32
    %388 = vector.broadcast %cst_72 : f32 to vector<1x256xf32>
    %389 = arith.select %33, %386, %388 : vector<1x256xi1>, vector<1x256xf32>
    %390 = vector.broadcast %387 : f32 to vector<1x256xf32>
    %391 = arith.mulf %390, %389 : vector<1x256xf32>
    %392 = arith.addf %385, %391 : vector<1x256xf32>
    %393 = vector.extract_strided_slice %7 {offsets = [0, 65], sizes = [1, 256], strides = [1, 1]} : vector<1x324xf32> to vector<1x256xf32>
    %c46 = arith.constant 46 : index
    %394 = memref.load %arg2[%c46] : memref<50xf32, #tpu.memory_space<smem>>
    %cst_73 = arith.constant 0.000000e+00 : f32
    %395 = vector.broadcast %cst_73 : f32 to vector<1x256xf32>
    %396 = arith.select %42, %393, %395 : vector<1x256xi1>, vector<1x256xf32>
    %397 = vector.broadcast %394 : f32 to vector<1x256xf32>
    %398 = arith.mulf %397, %396 : vector<1x256xf32>
    %399 = arith.addf %392, %398 : vector<1x256xf32>
    %400 = vector.extract_strided_slice %7 {offsets = [0, 66], sizes = [1, 256], strides = [1, 1]} : vector<1x324xf32> to vector<1x256xf32>
    %c47 = arith.constant 47 : index
    %401 = memref.load %arg2[%c47] : memref<50xf32, #tpu.memory_space<smem>>
    %cst_74 = arith.constant 0.000000e+00 : f32
    %402 = vector.broadcast %cst_74 : f32 to vector<1x256xf32>
    %403 = arith.select %51, %400, %402 : vector<1x256xi1>, vector<1x256xf32>
    %404 = vector.broadcast %401 : f32 to vector<1x256xf32>
    %405 = arith.mulf %404, %403 : vector<1x256xf32>
    %406 = arith.addf %399, %405 : vector<1x256xf32>
    %407 = vector.extract_strided_slice %7 {offsets = [0, 67], sizes = [1, 256], strides = [1, 1]} : vector<1x324xf32> to vector<1x256xf32>
    %c48 = arith.constant 48 : index
    %408 = memref.load %arg2[%c48] : memref<50xf32, #tpu.memory_space<smem>>
    %cst_75 = arith.constant 0.000000e+00 : f32
    %409 = vector.broadcast %cst_75 : f32 to vector<1x256xf32>
    %410 = arith.select %60, %407, %409 : vector<1x256xi1>, vector<1x256xf32>
    %411 = vector.broadcast %408 : f32 to vector<1x256xf32>
    %412 = arith.mulf %411, %410 : vector<1x256xf32>
    %413 = arith.addf %406, %412 : vector<1x256xf32>
    %414 = vector.extract_strided_slice %7 {offsets = [0, 68], sizes = [1, 256], strides = [1, 1]} : vector<1x324xf32> to vector<1x256xf32>
    %c49 = arith.constant 49 : index
    %415 = memref.load %arg2[%c49] : memref<50xf32, #tpu.memory_space<smem>>
    %cst_76 = arith.constant 0.000000e+00 : f32
    %416 = vector.broadcast %cst_76 : f32 to vector<1x256xf32>
    %417 = arith.select %69, %414, %416 : vector<1x256xi1>, vector<1x256xf32>
    %418 = vector.broadcast %415 : f32 to vector<1x256xf32>
    %419 = arith.mulf %418, %417 : vector<1x256xf32>
    %420 = arith.addf %413, %419 : vector<1x256xf32>
    %421 = arith.negf %420 : vector<1x256xf32>
    %422 = math.exp %421 : vector<1x256xf32>
    %cst_77 = arith.constant 1.000000e+00 : f32
    %423 = vector.broadcast %cst_77 : f32 to vector<1x256xf32>
    %424 = arith.addf %423, %422 : vector<1x256xf32>
    %425 = arith.divf %423, %424 : vector<1x256xf32>
    %426 = vector.shape_cast %425 : vector<1x256xf32> to vector<1x1x256xf32>
    %427 = vector.broadcast %426 : vector<1x1x256xf32> to vector<1x4x256xf32>
    %428 = arith.mulf %427, %0 : vector<1x4x256xf32>
    %c0_78 = arith.constant 0 : index
    %c0_79 = arith.constant 0 : index
    %c0_80 = arith.constant 0 : index
    %429 = vector.load %arg3[%c0_78, %c0_79, %c0_80] : memref<1x4x256xf32, #tpu.memory_space<vmem>>, vector<1x4x256xf32>
    tpu.vector_store %arg3[%c0_78, %c0_79, %c0_80], %428 {strides = array<i32>} : memref<1x4x256xf32, #tpu.memory_space<vmem>>, vector<1x4x256xf32>,
    return
  }
  func.func @transform_0(%arg0: i32) -> (i32, i32, i32) {
    %c0_i32 = arith.constant 0 : i32
    %c0_i32_0 = arith.constant 0 : i32
    %c0_i32_1 = arith.constant 0 : i32
    return %arg0, %c0_i32, %c0_i32_0 : i32, i32, i32
  }
  func.func @transform_1(%arg0: i32) -> i32 {
    %c0_i32 = arith.constant 0 : i32
    %c0_i32_0 = arith.constant 0 : i32
    return %c0_i32 : i32
  }
  func.func @transform_2(%arg0: i32) -> (i32, i32, i32) {
    %c0_i32 = arith.constant 0 : i32
    %c0_i32_0 = arith.constant 0 : i32
    %c0_i32_1 = arith.constant 0 : i32
    return %arg0, %c0_i32, %c0_i32_0 : i32, i32, i32
  }
}

</mosaic_0001>

<bundles_post_ra>
// kernel: tpu_custom_call.1
= control target key start
LH: loop header
LB: loop body
LE: loop exit
PB: predicated region body
PF: predicated region fallthrough
CT: control target
= control target key end

     0   :  { %7 = vsyncpa [#allocation3], 0  ;;  %s2641_s0 = inlined_call_operand.hbm [shape: f32[2,4,256], index: 0, kind: input, shape index: {}]   ;;  %s2642_s1 = inlined_call_operand.hbm [shape: f32[50], index: 1, kind: input, shape index: {}]   ;;  %s2643_s2 = inlined_call_operand.hbm [shape: f32[2,4,256], index: 2, kind: output, shape index: {}]  }
   0x1   :  { %9 = vsyncpa [#allocation3 + $0x1], 0 }
   0x2   :  { %10 = vsyncpa [#allocation5], 0 }
   0x3   :  { %11 = vsyncpa [#allocation4], 0 }
   0x4   :  { %13 = vsyncpa [#allocation4 + $0x1], 0  ;;  %s1697_s9 = smov 0   ;;  %s1699_s10 = smov 0  }
   0x5   :  { %s1701_s11 = smov 0   ;;  %s1703_s12 = smov 0  }
   0x6 LB: > { %s1718_s13 = sadd.s32 4294967295, %s1653_s12   ;;  %s1376_s14 = sadd.s32 4294967294, %s1653_s12   ;;  %s1653_s12 = sphi %s1703_s12, %s2728_s12   ;;  %s1649_s11 = sphi %s1701_s11, %s2727_s11   ;;  %s1645_s10 = sphi %s1699_s10, %s2726_s10   ;;  %s1641_s9 = sphi %s1697_s9, %s2725_s9  }
   0x7   : > { %p39_p0 = scmp.ne.s32.totalorder %s1645_s10, %s1641_s9  ;;  %p40_p1 = scmp.eq.s32.totalorder %s1718_s13, 0 }
   0x8   : > { %p84_p2 = scmp.eq.s32.totalorder %s1718_s13, 1  ;;  %p90_p3 = scmp.eq.s32.totalorder %s1376_s14, 1 }
   0x9   : > { %p1727_p4 = por %p40_p1, %p39_p0  ;;  %p1377_p5 = scmp.ge.s32.totalorder %s1653_s12, 1 }
   0xa   : > { %p1732_p6 = por %p90_p3, %p39_p0  ;;  %p97_p7 = scmp.lt.s32.totalorder %s1653_s12, 3 }
   0xb   : > { %s109_s19 = sshll.u32 %s2642_s1, 4  ;;  %s1748_s21 = sadd.s32 1, %s1653_s12   ;;  %s110_s19 = int_to_ptr.hbm [resolvable:$true] %s109_s19 }
   0xc   : > { %p1740_p8 = pnand %p1377_p5, %p97_p7  ;;  %s23_s22 = ssub.s32 %s1653_s12, %s1748_s21 }
   0xd   : > { %p24_p12 = scmp.eq.s32.totalorder %s23_s22, 0  ;;  %s26_s23 = sadd.s32 1, %s1649_s11 }
   0xe   : > { %p1453_p10 = pneg %p1740_p8  ;;  %p33_p13 = scmp.ne.s32.totalorder %s1649_s11, %s1645_s10 }
   0xf   : > { %s1655_s24 = smov [#allocation6]   ;;  %p34_p0 = scmp.eq.s32.totalorder %s1653_s12, 0 }
  0x10   : > { %p1454_p11 = pnand %p1453_p10, %p40_p1  ;;  %p1763_p3 = por %p84_p2, %p33_p13 }
  0x11   : > { %s1758_s25 = scalar_select %p24_p12, %s1649_s11, %s26_s23  }
  0x12   : > { %1456 = dma.hbm_to_smem (!%p1454_p11), %s110_s19, 16, %s1655_s24, [#allocation5]  }
  0x13   : > { %s120_s27 = sand.u32 1, %s1649_s11   ;;  %p35_p5 = por %p34_p0, %p33_p13 }
  0x14   : > { %p1466_p7 = scmp.lt.s32.totalorder %s1653_s12, 2  ;;  %s1380_s28 = sshll.u32 %s120_s27, 3 }
  0x15   : > { %s1443_s29 = sshll.u32 %s1653_s12, 3  ;;  %s124_s6 = scalar_lea.vmem [#allocation2], %s1380_s28 }
  0x16   : > { %s129_s4 = scalar_lea.hbm %s2641_s0, %s1443_s29  ;;  %s133_s7 = sshll.u32 %s124_s6, 4  ;;  %s134_s7 = int_to_ptr.vmem [resolvable:$true] %s133_s7 }
  0x17   : > { %s131_s5 = sshll.u32 %s129_s4, 4  ;;  %p1773_p10 = pnand %p1466_p7, %p35_p5  ;;  %s132_s5 = int_to_ptr.hbm [resolvable:$true] %s131_s5 }
  0x18   : > { %s121_s14 = scalar_lea.sflag [#allocation3], %s120_s27  ;;  %s1553_s17 = sshra.s32 %s132_s5, 4  ;;  %s1554_s17 = int_to_ptr.hbm [resolvable:$true] %s1553_s17 }
  0x19   : > { %s1555_s18 = scalar_lea.hbm %s1554_s17, 8  ;;  %p1557_p11 = pneg %p1773_p10 }
  0x1a   : > { %p1556_p2 = scmp.ne.s32.totalorder %s1554_s17, %s1555_s18  ;;  %s1560_s23 = scalar_lea.hbm %s2641_s0, 16 }
  0x1b   : > { %p1561_p0 = scmp.lt.s32.totalorder %s1554_s17, %s2641_s0  ;;  %p1562_p5 = scmp.lt.s32.totalorder %s1560_s23, %s1555_s18 }
  0x1c   : > { %p1558_p12 = pnand %p1557_p11, %p1556_p2 }
  0x1d   : > { %p1563_p7 = por %p1562_p5, %p1561_p0 }
  0x1e   : > { %p1559_p13 = pneg %p1558_p12 }
  0x20   : > { %p1564_p9 = pnand %p1563_p7, %p1559_p13 }
  0x22   : > { %1567 = shalt.err (!%p1564_p9)
}
  0x23   : > { %1460 = dma.hbm_to_vmem [thread:$0]  (!%p1773_p10), %s132_s5, 128, %s134_s7, %s121_s14  }
  0x24   : > { %142 = sbr.rel (%p1740_p8) target bundleno = 727 (0x2d7), region = 28  ;;  %s1790_s27 = sand.u32 (!%p1740_p8), 1, %s1645_s10  }
  0x25   : > { %s2644_s29 = sshll.u32 (!%p1740_p8), %s1790_s27, 3  ;;  %s145_s30 = scalar_lea.sflag (!%p1740_p8), [#allocation3], %s1790_s27 }
  0x26   : > { %s148_s3 = scalar_lea.vmem (!%p1740_p8), [#allocation2], %s2644_s29 }
  0x29   : > { %1628 = dma.done.wait (%p1727_p4), %s145_s30, 128  }
  0x2a   : > { %1630 = vsyncadd (%p1727_p4), %s145_s30, 4294967168 }
  0x2b   : > { %1632 = dma.done.wait (%p40_p1), [#allocation5], 16  }
  0x2c   : > { %1634 = vsyncadd (%p40_p1), [#allocation5], 4294967280 }
  0x2d   : > { %159 = sfence }
  0x2e   : > { %v176_v0 = vld [vmem:[%s148_s3] sm:$0xff]  ;;  %v1656_v1 = vmov 4.0   ;;  %vm2655_vm0 = vcmask 1043456   ;;  %s1657_s15 = smov 34   ;;  %vm232_vm2 = vcmask 277504   ;;  %s1658_s20 = smov 126   ;;  %v251_v51 = vlaneseq }
  0x2f   : > { %178 = vst [vmem:[#allocation1] ss:$2 sm:$0xff] %v176_v0  ;;  %1528 = vrcp.f32 %v1656_v1  ;;  %s1659_s4 = smov 127   ;;  %s1660_s5 = smov 125   ;;  %vm333_vm3 = vcmask 1039360   ;;  %vm352_vm6 = vcmask 1031168  }
  0x30   : > { %s1661_s6 = smov 124   ;;  %s1662_s7 = smov 112   ;;  %v252_v52 = vand.u32 127, %v251_v51  ;;  %vm371_vm7 = vcmask 1022976   ;;  %vm2658_vm11 = vcmask 1014784   ;;  %vm2659_vm13 = vcmask 916480  }
  0x31   : > { %s1663_s8 = smov 111   ;;  %s1664_s14 = smov 110   ;;  %vm2664_vm15 = vcmask 908288  }
  0x32   : > { %s1665_s17 = smov 109   ;;  %s1666_s18 = smov 108   ;;  %v258_v54 = vand.u32 15, %v252_v52 }
  0x33   : > { %s1667_s19 = smov 96   ;;  %s1668_s22 = smov 95  }
  0x34   : > { %s2645_s23 = smov 94   ;;  %s1670_s24 = smov 93   ;;  %v1905_v56 = vadd.s32 4294967295, %v258_v54  ;;  %v1909_v57 = vadd.s32 4294967294, %v258_v54 }
  0x35   : > { %v1529_v2 = vpop.eup %1528  ;;  %s2656_s28 = smov 92   ;;  %s1903_s30 = sld [smem:[#allocation6 + $0x1]] }
  0x36   : > { %v179_v3 = vld.sshfl [vmem:[#allocation1] sm:$0xff pattern:$0x75316420]  ;;  %v180_v4 = vld.sshfl [vmem:[#allocation1 + $0x8] sm:$0xff pattern:$0x75316420]  ;;  %vm203_vm1 = vweird.f32 %v1529_v2 }
  0x37   : > { %v184_v5 = vsel %vm2655_vm0, %v179_v3, 0.0  ;;  %v191_v6 = vsel %vm2655_vm0, %v180_v4, 0.0  ;;  %v199_v7 = vmul.f32 4.0, %v1529_v2  ;;  %207 = vst [vmem:[#allocation1] ss:$2 sm:$0xff] %v176_v0  ;;  %s1907_s3 = sld [smem:[#allocation6]] }
  0x38   : > { %v185_v8 = vrot.slane %v184_v5, 4  ;;  %v192_v9 = vrot.slane %v191_v6, 4  ;;  %s1917_s29 = sld [smem:[#allocation6 + $0x2]]  ;;  %vm288_vm4 = vcmp.ge.s32.totalorder %v1905_v56, 0  ;;  %vm280_vm5 = vcmp.ge.s32.totalorder %v1909_v57, 0 }
  0x39   : > { %v200_v10 = vsub.f32 1.0, %v199_v7 }
  0x3a   : > { %v186_v11 = vadd.f32 %v185_v8, %v184_v5  ;;  %v193_v12 = vadd.f32 %v192_v9, %v191_v6  ;;  %v1942_v9 = vadd.s32 1, %v258_v54 }
  0x3b   : > { %v201_v13 = vmul.f32 %v1529_v2, %v200_v10  ;;  %v340_v59 = vstv %s1903_s30  ;;  %s1935_s30 = sld [smem:[#allocation6 + $0x3]] }
  0x3c   : > { %v187_v14 = vrot.slane %v186_v11, 2  ;;  %v194_v15 = vrot.slane %v193_v12, 2  ;;  %vm304_vm8 = vcmp.lt.s32.totalorder %v1942_v9, 16 }
  0x3d   : > { %v202_v16 = vadd.f32 %v1529_v2, %v201_v13  ;;  %v319_v62 = vstv %s1907_s3  ;;  %s1959_s3 = sld [smem:[#allocation6 + $0x4]] }
  0x3e   : > { %v188_v17 = vadd.f32 %v187_v14, %v186_v11  ;;  %v195_v18 = vadd.f32 %v194_v15, %v193_v12  ;;  %v208_v19 = vld.sshfl [vmem:[#allocation1] sm:$0xff pattern:$0x75316420]  ;;  %v209_v20 = vld.sshfl [vmem:[#allocation1 + $0x8] sm:$0xff pattern:$0x75316420]  ;;  %v359_v1 = vstv %s1917_s29 }
  0x3f   : > { %v212_v21 = vsel %vm2655_vm0, %v208_v19, -inf  ;;  %v219_v22 = vsel %vm2655_vm0, %v209_v20, -inf  ;;  %1264 = vst [vmem:[#allocation1] ss:$2 sm:$0xff] %v176_v0  ;;  %v204_v26 = vsel %vm203_vm1, %v1529_v2, %v202_v16  ;;  %v253_v0 = vadd.s32 128, %v252_v52  ;;  %s2651_s29 = smov 78  }
  0x40   : > { %v189_v23 = vrot.slane %v188_v17, 1  ;;  %v213_v24 = vrot.slane %v212_v21, 4  ;;  %v220_v25 = vrot.slane %v219_v22, 4  ;;  %v196_v28 = vrot.slane %v195_v18, 1 }
  0x41   : > { %v1940_v8 = vand.u32 15, %v253_v0  ;;  %v378_v13 = vstv %s1935_s30  ;;  %s2653_s30 = smov 77   ;;  %vm2666_vm0 = vcmask 900096  }
  0x42   : > { %v190_v27 = vadd.f32 %v189_v23, %v188_v17  ;;  %v214_v29 = vmax.f32 %v212_v21, %v213_v24  ;;  %v221_v30 = vmax.f32 %v219_v22, %v220_v25  ;;  %v197_v34 = vadd.f32 %v196_v28, %v195_v18 }
  0x43   : > { %v1945_v11 = vadd.s32 4294967295, %v1940_v8  ;;  %v1952_v12 = vadd.s32 4294967294, %v1940_v8  ;;  %v1969_v22 = vadd.s32 2, %v258_v54 }
  0x44   : > { %v205_v31 = vmul.f32 %v204_v26, %v190_v27  ;;  %v215_v32 = vrot.slane %v214_v29, 2  ;;  %v222_v33 = vrot.slane %v221_v30, 2  ;;  %v206_v38 = vmul.f32 %v204_v26, %v197_v34 }
  0x45   : > { %vm289_vm9 = vcmp.ge.s32.totalorder %v1945_v11, 0  ;;  %vm281_vm10 = vcmp.ge.s32.totalorder %v1952_v12, 0  ;;  %vm312_vm12 = vcmp.lt.s32.totalorder %v1969_v22, 16  ;;  %v397_v27 = vstv %s1959_s3  ;;  %s2662_s3 = smov 76  }
  0x46   : > { %228 = vrot.lane.b32.xlu0 %v205_v31, %s1657_s15  ;;  %v216_v35 = vmax.f32 %v214_v29, %v215_v32  ;;  %v223_v37 = vmax.f32 %v221_v30, %v222_v33 }
  0x48   : > { %v217_v36 = vrot.slane %v216_v35, 1  ;;  %v224_v40 = vrot.slane %v223_v37, 1 }
  0x4a   : > { %v218_v39 = vmax.f32 %v216_v35, %v217_v36  ;;  %v225_v41 = vmax.f32 %v223_v37, %v224_v40  ;;  %v1989_v37 = vadd.s32 1, %v1940_v8 }
  0x4c   : > { %241 = vrot.lane.b32.xlu1 %v218_v39, %s1657_s15  ;;  %vm305_vm14 = vcmp.lt.s32.totalorder %v1989_v37, 16 }
  0x4e   : > { %230 = vrot.lane.b32.xlu0 %v206_v38, %s1657_s15 }
  0x54   : > { %243 = vrot.lane.b32.xlu1 %v225_v41, %s1657_s15  ;;  %s2647_s15 = smov 80  }
  0xb8   : > { %v229_v42 = vpop.permute.xlu0 %228 }
  0xb9   : > { %v1809_v43 = vsel %vm232_vm2, 0.0, %v229_v42 }
  0xba   : > { %346 = vrot.lane.b32.xlu1 %v1809_v43, %s1658_s20  ;;  %327 = vrot.lane.b32.xlu2 %v1809_v43, %s1659_s4  ;;  %v317_v61 = vsel %vm280_vm5, %v1809_v43, 0.0 }
  0xbb   : > { %v320_v2 = vmul.f32 %v319_v62, %v317_v61 }
  0xbe   : > { %v1869_v47 = vpop.permute.xlu1 %241 }
  0xc0   : > { %v231_v44 = vpop.permute.xlu0 %230 }
  0xc1   : > { %v1816_v45 = vsel %vm232_vm2, %v229_v42, %v231_v44  ;;  %v1819_v46 = vsel %vm232_vm2, %v231_v44, 0.0 }
  0xc2   : > { %365 = vrot.lane.b32.xlu1 %v1809_v43, %s1660_s5  ;;  %331 = vrot.lane.b32.xlu0 %v1819_v46, %s1659_s4  ;;  %v318_v24 = vsel %vm281_vm10, %v1816_v45, 0.0 }
  0xc3   : > { %329 = vrot.lane.b32.xlu2 %v1816_v45, %s1659_s4  ;;  %v321_v26 = vmul.f32 %v319_v62, %v318_v24 }
  0xc6   : > { %v1877_v48 = vpop.permute.xlu1 %243 }
  0xc7   : > { %v1882_v49 = vsel %vm232_vm2, %v1869_v47, %v1877_v48 }
  0xca   : > { %384 = vrot.lane.b32.xlu1 %v1809_v43, %s1661_s6  ;;  %350 = vrot.lane.b32.xlu0 %v1819_v46, %s1658_s20 }
  0xcb   : > { %348 = vrot.lane.b32.xlu2 %v1816_v45, %s1658_s20 }
  0xd2   : > { %403 = vrot.lane.b32.xlu1 %v1809_v43, %s1662_s7  ;;  %369 = vrot.lane.b32.xlu0 %v1819_v46, %s1660_s5 }
  0xd3   : > { %367 = vrot.lane.b32.xlu2 %v1816_v45, %s1660_s5 }
  0xda   : > { %422 = vrot.lane.b32.xlu1 %v1809_v43, %s1663_s8  ;;  %388 = vrot.lane.b32.xlu0 %v1819_v46, %s1661_s6 }
  0xdb   : > { %386 = vrot.lane.b32.xlu2 %v1816_v45, %s1661_s6 }
  0xe2   : > { %441 = vrot.lane.b32.xlu1 %v1809_v43, %s1664_s14  ;;  %407 = vrot.lane.b32.xlu0 %v1819_v46, %s1662_s7 }
  0xe3   : > { %405 = vrot.lane.b32.xlu2 %v1816_v45, %s1662_s7 }
  0xea   : > { %460 = vrot.lane.b32.xlu1 %v1809_v43, %s1665_s17  ;;  %426 = vrot.lane.b32.xlu0 %v1819_v46, %s1663_s8 }
  0xeb   : > { %424 = vrot.lane.b32.xlu2 %v1816_v45, %s1663_s8 }
  0xf2   : > { %479 = vrot.lane.b32.xlu1 %v1809_v43, %s1666_s18  ;;  %445 = vrot.lane.b32.xlu0 %v1819_v46, %s1664_s14 }
  0xf3   : > { %443 = vrot.lane.b32.xlu2 %v1816_v45, %s1664_s14 }
  0xfa   : > { %498 = vrot.lane.b32.xlu1 %v1809_v43, %s1667_s19  ;;  %464 = vrot.lane.b32.xlu0 %v1819_v46, %s1665_s17 }
  0xfb   : > { %462 = vrot.lane.b32.xlu2 %v1816_v45, %s1665_s17 }
 0x102   : > { %517 = vrot.lane.b32.xlu1 %v1809_v43, %s1668_s22  ;;  %483 = vrot.lane.b32.xlu0 %v1819_v46, %s1666_s18 }
 0x103   : > { %481 = vrot.lane.b32.xlu2 %v1816_v45, %s1666_s18 }
 0x10a   : > { %536 = vrot.lane.b32.xlu1 %v1809_v43, %s2645_s23  ;;  %502 = vrot.lane.b32.xlu0 %v1819_v46, %s1667_s19 }
 0x10b   : > { %500 = vrot.lane.b32.xlu2 %v1816_v45, %s1667_s19 }
 0x112   : > { %555 = vrot.lane.b32.xlu1 %v1809_v43, %s1670_s24  ;;  %521 = vrot.lane.b32.xlu0 %v1819_v46, %s1668_s22 }
 0x113   : > { %519 = vrot.lane.b32.xlu2 %v1816_v45, %s1668_s22 }
 0x114   : > { %v328_v50 = vpop.permute.xlu2 %327 }
 0x11a   : > { %574 = vrot.lane.b32.xlu1 %v1809_v43, %s2656_s28  ;;  %540 = vrot.lane.b32.xlu0 %v1819_v46, %s2645_s23 }
 0x11b   : > { %538 = vrot.lane.b32.xlu2 %v1816_v45, %s2645_s23  ;;  %s2649_s23 = smov 79  }
 0x11d   : > { %v330_v53 = vpop.permute.xlu2 %329 }
 0x11e   : > { %v334_v55 = vsel %vm333_vm3, %v328_v50, %v330_v53 }
 0x11f   : > { %v338_v60 = vsel %vm288_vm4, %v334_v55, 0.0 }
 0x120   : > { %v341_v63 = vmul.f32 %v340_v59, %v338_v60 }
 0x122   : > { %593 = vrot.lane.b32.xlu1 %v1809_v43, %s2647_s15  ;;  %559 = vrot.lane.b32.xlu0 %v1819_v46, %s1670_s24  ;;  %v343_v6 = vadd.f32 %v341_v63, %v320_v2 }
 0x123   : > { %557 = vrot.lane.b32.xlu2 %v1816_v45, %s1670_s24 }
 0x125   : > { %v349_v58 = vpop.permute.xlu2 %348 }
 0x12a   : > { %612 = vrot.lane.b32.xlu1 %v1809_v43, %s2649_s23  ;;  %578 = vrot.lane.b32.xlu0 %v1819_v46, %s2656_s28 }
 0x12b   : > { %576 = vrot.lane.b32.xlu2 %v1816_v45, %s2656_s28  ;;  %s1679_s28 = smov 62  }
 0x12c   : > { %v347_v3 = vpop.permute.xlu1 %346 }
 0x12d   : > { %v353_v4 = vsel %vm352_vm6, %v347_v3, %v349_v58  ;;  %v1938_v5 = vpop.permute.xlu2 %367 }
 0x12e   : > { %v360_v7 = vmul.f32 %v359_v1, %v353_v4 }
 0x130   : > { %v362_v10 = vadd.f32 %v360_v7, %v343_v6 }
 0x132   : > { %631 = vrot.lane.b32.xlu1 %v1809_v43, %s2651_s29  ;;  %597 = vrot.lane.b32.xlu0 %v1819_v46, %s2647_s15 }
 0x133   : > { %595 = vrot.lane.b32.xlu2 %v1816_v45, %s2647_s15  ;;  %s1982_s15 = sld [smem:[#allocation6 + $0x5]] }
 0x134   : > { %v366_v14 = vpop.permute.xlu1 %365  ;;  %v332_v15 = vpop.permute.xlu0 %331 }
 0x135   : > { %v372_v16 = vsel %vm371_vm7, %v366_v14, %v1938_v5  ;;  %v335_v17 = vsel %vm333_vm3, %v330_v53, %v332_v15  ;;  %v387_v18 = vpop.permute.xlu2 %386 }
 0x136   : > { %v376_v19 = vsel %vm304_vm8, %v372_v16, 0.0  ;;  %v339_v21 = vsel %vm289_vm9, %v335_v17, 0.0 }
 0x137   : > { %v379_v20 = vmul.f32 %v378_v13, %v376_v19  ;;  %v342_v25 = vmul.f32 %v340_v59, %v339_v21 }
 0x139   : > { %v381_v23 = vadd.f32 %v379_v20, %v362_v10  ;;  %v344_v33 = vadd.f32 %v342_v25, %v321_v26  ;;  %v416_v40 = vstv %s1982_s15  ;;  %s2660_s15 = smov 64  }
 0x13a   : > { %650 = vrot.lane.b32.xlu1 %v1809_v43, %s2653_s30  ;;  %616 = vrot.lane.b32.xlu0 %v1819_v46, %s2649_s23 }
 0x13b   : > { %614 = vrot.lane.b32.xlu2 %v1816_v45, %s2649_s23  ;;  %s1999_s23 = sld [smem:[#allocation6 + $0x6]] }
 0x13c   : > { %v385_v28 = vpop.permute.xlu1 %384  ;;  %v351_v29 = vpop.permute.xlu0 %350 }
 0x13d   : > { %v391_v30 = vsel %vm2658_vm11, %v385_v28, %v387_v18  ;;  %v354_v31 = vsel %vm352_vm6, %v349_v58, %v351_v29  ;;  %v406_v32 = vpop.permute.xlu2 %405  ;;  %v2009_v58 = vadd.s32 2, %v1940_v8 }
 0x13e   : > { %v395_v34 = vsel %vm312_vm12, %v391_v30, 0.0  ;;  %v361_v35 = vmul.f32 %v359_v1, %v354_v31 }
 0x13f   : > { %v398_v36 = vmul.f32 %v397_v27, %v395_v34  ;;  %vm313_vm1 = vcmp.lt.s32.totalorder %v2009_v58, 16 }
 0x140   : > { %v363_v38 = vadd.f32 %v361_v35, %v344_v33 }
 0x141   : > { %v400_v39 = vadd.f32 %v398_v36, %v381_v23  ;;  %v435_v61 = vstv %s1999_s23  ;;  %s2034_s23 = sld [smem:[#allocation6 + $0x8]] }
 0x142   : > { %669 = vrot.lane.b32.xlu1 %v1809_v43, %s2662_s3  ;;  %635 = vrot.lane.b32.xlu0 %v1819_v46, %s2651_s29 }
 0x143   : > { %633 = vrot.lane.b32.xlu2 %v1816_v45, %s2651_s29  ;;  %s2018_s29 = sld [smem:[#allocation6 + $0x7]] }
 0x144   : > { %v404_v41 = vpop.permute.xlu1 %403  ;;  %v370_v42 = vpop.permute.xlu0 %369 }
 0x145   : > { %v410_v44 = vsel %vm2659_vm13, %v404_v41, %v406_v32  ;;  %v373_v50 = vsel %vm371_vm7, %v1938_v5, %v370_v42  ;;  %v425_v51 = vpop.permute.xlu2 %424 }
 0x146   : > { %v414_v52 = vsel %vm280_vm5, %v410_v44, 0.0  ;;  %v377_v53 = vsel %vm305_vm14, %v373_v50, 0.0 }
 0x147   : > { %v417_v54 = vmul.f32 %v416_v40, %v414_v52  ;;  %v380_v55 = vmul.f32 %v378_v13, %v377_v53  ;;  %v473_v24 = vstv %s2034_s23  ;;  %s1680_s23 = smov 61  }
 0x149   : > { %v419_v59 = vadd.f32 %v417_v54, %v400_v39  ;;  %v382_v60 = vadd.f32 %v380_v55, %v363_v38  ;;  %v454_v10 = vstv %s2018_s29  ;;  %s2047_s29 = sld [smem:[#allocation6 + $0x9]] }
 0x14a   : > { %688 = vrot.lane.b32.xlu1 %v1809_v43, %s2660_s15  ;;  %654 = vrot.lane.b32.xlu0 %v1819_v46, %s2653_s30 }
 0x14b   : > { %652 = vrot.lane.b32.xlu2 %v1816_v45, %s2653_s30  ;;  %s1678_s30 = smov 63  }
 0x14c   : > { %v423_v62 = vpop.permute.xlu1 %422  ;;  %v389_v63 = vpop.permute.xlu0 %388 }
 0x14d   : > { %v429_v0 = vsel %vm2664_vm15, %v423_v62, %v425_v51  ;;  %v392_v1 = vsel %vm2658_vm11, %v387_v18, %v389_v63  ;;  %v444_v2 = vpop.permute.xlu2 %443  ;;  %vm2665_vm11 = vcmask 891904  }
 0x14e   : > { %v433_v3 = vsel %vm288_vm4, %v429_v0, 0.0  ;;  %v396_v4 = vsel %vm313_vm1, %v392_v1, 0.0 }
 0x14f   : > { %v436_v5 = vmul.f32 %v435_v61, %v433_v3  ;;  %v399_v6 = vmul.f32 %v397_v27, %v396_v4  ;;  %v492_v36 = vstv %s2047_s29  ;;  %s2075_s29 = sld [smem:[#allocation6 + $0xb]] }
 0x151   : > { %v438_v7 = vadd.f32 %v436_v5, %v419_v59  ;;  %v401_v8 = vadd.f32 %v399_v6, %v382_v60 }
 0x152   : > { %707 = vrot.lane.b32.xlu1 %v1809_v43, %s1678_s30  ;;  %673 = vrot.lane.b32.xlu0 %v1819_v46, %s2662_s3 }
 0x153   : > { %671 = vrot.lane.b32.xlu2 %v1816_v45, %s2662_s3  ;;  %s1681_s3 = smov 60  }
 0x154   : > { %v442_v13 = vpop.permute.xlu1 %441  ;;  %v408_v14 = vpop.permute.xlu0 %407 }
 0x155   : > { %v448_v15 = vsel %vm2666_vm0, %v442_v13, %v444_v2  ;;  %v411_v16 = vsel %vm2659_vm13, %v406_v32, %v408_v14  ;;  %v463_v17 = vpop.permute.xlu2 %462  ;;  %vm2667_vm13 = vcmask 883712   ;;  %v530_v5 = vstv %s2075_s29  ;;  %s2109_s29 = sld [smem:[#allocation6 + $0xd]] }
 0x156   : > { %v455_v18 = vmul.f32 %v454_v10, %v448_v15  ;;  %v415_v19 = vsel %vm281_vm10, %v411_v16, 0.0 }
 0x157   : > { %v418_v20 = vmul.f32 %v416_v40, %v415_v19 }
 0x158   : > { %v457_v21 = vadd.f32 %v455_v18, %v438_v7 }
 0x159   : > { %v420_v23 = vadd.f32 %v418_v20, %v401_v8 }
 0x15a   : > { %726 = vrot.lane.b32.xlu1 %v1809_v43, %s1679_s28  ;;  %692 = vrot.lane.b32.xlu0 %v1819_v46, %s2660_s15 }
 0x15b   : > { %690 = vrot.lane.b32.xlu2 %v1816_v45, %s2660_s15  ;;  %s2062_s15 = sld [smem:[#allocation6 + $0xa]] }
 0x15c   : > { %v461_v25 = vpop.permute.xlu1 %460  ;;  %v427_v26 = vpop.permute.xlu0 %426 }
 0x15d   : > { %v467_v27 = vsel %vm2665_vm11, %v461_v25, %v463_v17  ;;  %v430_v28 = vsel %vm2664_vm15, %v425_v51, %v427_v26  ;;  %v482_v29 = vpop.permute.xlu2 %481  ;;  %vm504_vm15 = vcmask 785408  }
 0x15e   : > { %v471_v30 = vsel %vm304_vm8, %v467_v27, 0.0  ;;  %v434_v31 = vsel %vm289_vm9, %v430_v28, 0.0 }
 0x15f   : > { %v474_v32 = vmul.f32 %v473_v24, %v471_v30  ;;  %v437_v33 = vmul.f32 %v435_v61, %v434_v31  ;;  %v568_v30 = vstv %s2109_s29  ;;  %s2255_s29 = sld [smem:[#allocation6 + $0x17]] }
 0x161   : > { %v476_v34 = vadd.f32 %v474_v32, %v457_v21  ;;  %v439_v35 = vadd.f32 %v437_v33, %v420_v23  ;;  %v511_v54 = vstv %s2062_s15  ;;  %s2093_s15 = sld [smem:[#allocation6 + $0xc]] }
 0x162   : > { %745 = vrot.lane.b32.xlu1 %v1809_v43, %s1680_s23  ;;  %711 = vrot.lane.b32.xlu0 %v1819_v46, %s1678_s30 }
 0x163   : > { %709 = vrot.lane.b32.xlu2 %v1816_v45, %s1678_s30 }
 0x164   : > { %v480_v38 = vpop.permute.xlu1 %479  ;;  %v446_v39 = vpop.permute.xlu0 %445 }
 0x165   : > { %v486_v40 = vsel %vm2667_vm13, %v480_v38, %v482_v29  ;;  %v449_v41 = vsel %vm2666_vm0, %v444_v2, %v446_v39  ;;  %v501_v42 = vpop.permute.xlu2 %500  ;;  %v2085_v2 = vsel %vm232_vm2, 0.0, %v1869_v47  ;;  %vm2669_vm0 = vcmask 769024  }
 0x166   : > { %v490_v44 = vsel %vm312_vm12, %v486_v40, 0.0  ;;  %v456_v50 = vmul.f32 %v454_v10, %v449_v41 }
 0x167   : > { %v493_v51 = vmul.f32 %v492_v36, %v490_v44  ;;  %v549_v19 = vstv %s2093_s15  ;;  %s2126_s15 = sld [smem:[#allocation6 + $0xe]] }
 0x168   : > { %v458_v52 = vadd.f32 %v456_v50, %v439_v35 }
 0x169   : > { %v495_v53 = vadd.f32 %v493_v51, %v476_v34 }
 0x16a   : > { %764 = vrot.lane.b32.xlu1 %v1809_v43, %s1681_s3  ;;  %730 = vrot.lane.b32.xlu0 %v1819_v46, %s1679_s28 }
 0x16b   : > { %728 = vrot.lane.b32.xlu2 %v1816_v45, %s1679_s28 }
 0x16c   : > { %v499_v55 = vpop.permute.xlu1 %498  ;;  %v465_v59 = vpop.permute.xlu0 %464 }
 0x16d   : > { %v505_v60 = vsel %vm504_vm15, %v499_v55, %v501_v42  ;;  %v468_v61 = vsel %vm2665_vm11, %v463_v17, %v465_v59  ;;  %v520_v62 = vpop.permute.xlu2 %519  ;;  %vm2668_vm11 = vcmask 777216  }
 0x16e   : > { %v509_v43 = vsel %vm280_vm5, %v505_v60, 0.0  ;;  %v472_v63 = vsel %vm305_vm14, %v468_v61, 0.0 }
 0x16f   : > { %v512_v0 = vmul.f32 %v511_v54, %v509_v43  ;;  %v475_v1 = vmul.f32 %v473_v24, %v472_v63 }
 0x171   : > { %v514_v3 = vadd.f32 %v512_v0, %v495_v53  ;;  %v477_v4 = vadd.f32 %v475_v1, %v458_v52 }
 0x172   : > { %793 = vrot.lane.b32.xlu1 %v2085_v2, %s1659_s4  ;;  %749 = vrot.lane.b32.xlu0 %v1819_v46, %s1680_s23 }
 0x173   : > { %747 = vrot.lane.b32.xlu2 %v1816_v45, %s1680_s23 }
 0x174   : > { %v518_v6 = vpop.permute.xlu1 %517  ;;  %v484_v7 = vpop.permute.xlu0 %483 }
 0x175   : > { %v524_v47 = vsel %vm2668_vm11, %v518_v6, %v520_v62  ;;  %v487_v8 = vsel %vm2667_vm13, %v482_v29, %v484_v7  ;;  %v539_v10 = vpop.permute.xlu2 %538  ;;  %vm2670_vm13 = vcmask 760832  }
 0x176   : > { %v528_v13 = vsel %vm288_vm4, %v524_v47, 0.0  ;;  %v491_v14 = vsel %vm313_vm1, %v487_v8, 0.0 }
 0x177   : > { %v531_v15 = vmul.f32 %v530_v5, %v528_v13  ;;  %v494_v16 = vmul.f32 %v492_v36, %v491_v14 }
 0x179   : > { %v533_v17 = vadd.f32 %v531_v15, %v514_v3  ;;  %v496_v18 = vadd.f32 %v494_v16, %v477_v4 }
 0x17a   : > { %811 = vrot.lane.b32.xlu1 %v2085_v2, %s1658_s20  ;;  %768 = vrot.lane.b32.xlu0 %v1819_v46, %s1681_s3 }
 0x17b   : > { %766 = vrot.lane.b32.xlu2 %v1816_v45, %s1681_s3  ;;  %v2117_v45 = vsel %vm232_vm2, %v1877_v48, 0.0  ;;  %vm2671_vm2 = vcmask 752640  }
 0x17c   : > { %v537_v20 = vpop.permute.xlu1 %536  ;;  %v503_v21 = vpop.permute.xlu0 %502 }
 0x17d   : > { %v543_v23 = vsel %vm2669_vm0, %v537_v20, %v539_v10  ;;  %v506_v24 = vsel %vm504_vm15, %v501_v42, %v503_v21  ;;  %v558_v25 = vpop.permute.xlu2 %557  ;;  %v587_v42 = vstv %s2126_s15  ;;  %s2280_s15 = sld [smem:[#allocation6 + $0x19]] }
 0x17e   : > { %v550_v26 = vmul.f32 %v549_v19, %v543_v23  ;;  %v510_v27 = vsel %vm281_vm10, %v506_v24, 0.0 }
 0x17f   : > { %v513_v46 = vmul.f32 %v511_v54, %v510_v27 }
 0x180   : > { %v552_v28 = vadd.f32 %v550_v26, %v533_v17 }
 0x181   : > { %v515_v29 = vadd.f32 %v513_v46, %v496_v18 }
 0x182   : > { %829 = vrot.lane.b32.xlu1 %v2085_v2, %s1660_s5  ;;  %797 = vrot.lane.b32.xlu0 %v2117_v45, %s1659_s4 }
 0x183   : > { %795 = vrot.lane.b32.xlu2 %v1882_v49, %s1659_s4  ;;  %s2141_s4 = sld [smem:[#allocation6 + $0xf]] }
 0x184   : > { %v556_v31 = vpop.permute.xlu1 %555  ;;  %v522_v32 = vpop.permute.xlu0 %521 }
 0x185   : > { %v562_v48 = vsel %vm2670_vm13, %v556_v31, %v558_v25  ;;  %v525_v33 = vsel %vm2668_vm11, %v520_v62, %v522_v32  ;;  %v577_v34 = vpop.permute.xlu2 %576  ;;  %vm2672_vm11 = vcmask 654336  }
 0x186   : > { %v566_v35 = vsel %vm304_vm8, %v562_v48, 0.0  ;;  %v529_v36 = vsel %vm289_vm9, %v525_v33, 0.0 }
 0x187   : > { %v569_v38 = vmul.f32 %v568_v30, %v566_v35  ;;  %v532_v39 = vmul.f32 %v530_v5, %v529_v36 }
 0x189   : > { %v571_v40 = vadd.f32 %v569_v38, %v552_v28  ;;  %v534_v41 = vadd.f32 %v532_v39, %v515_v29  ;;  %v606_v62 = vstv %s2141_s4  ;;  %s2285_s4 = sld [smem:[#allocation6 + $0x1a]] }
 0x18a   : > { %847 = vrot.lane.b32.xlu1 %v2085_v2, %s1661_s6  ;;  %815 = vrot.lane.b32.xlu0 %v2117_v45, %s1658_s20 }
 0x18b   : > { %813 = vrot.lane.b32.xlu2 %v1882_v49, %s1658_s20  ;;  %s2154_s20 = sld [smem:[#allocation6 + $0x10]] }
 0x18c   : > { %v575_v44 = vpop.permute.xlu1 %574  ;;  %v541_v50 = vpop.permute.xlu0 %540 }
 0x18d   : > { %v581_v51 = vsel %vm2671_vm2, %v575_v44, %v577_v34  ;;  %v544_v52 = vsel %vm2669_vm0, %v539_v10, %v541_v50  ;;  %v596_v53 = vpop.permute.xlu2 %595  ;;  %vm2673_vm0 = vcmask 646144  }
 0x18e   : > { %v585_v54 = vsel %vm312_vm12, %v581_v51, 0.0  ;;  %v551_v55 = vmul.f32 %v549_v19, %v544_v52 }
 0x18f   : > { %v588_v59 = vmul.f32 %v587_v42, %v585_v54 }
 0x190   : > { %v553_v60 = vadd.f32 %v551_v55, %v534_v41 }
 0x191   : > { %v590_v61 = vadd.f32 %v588_v59, %v571_v40  ;;  %v625_v10 = vstv %s2154_s20  ;;  %s2685_s20 = smov 80  }
 0x192   : > { %865 = vrot.lane.b32.xlu1 %v2085_v2, %s1662_s7  ;;  %833 = vrot.lane.b32.xlu0 %v2117_v45, %s1660_s5 }
 0x193   : > { %831 = vrot.lane.b32.xlu2 %v1882_v49, %s1660_s5  ;;  %s2168_s5 = sld [smem:[#allocation6 + $0x11]] }
 0x194   : > { %v594_v43 = vpop.permute.xlu1 %593  ;;  %v560_v63 = vpop.permute.xlu0 %559 }
 0x195   : > { %v600_v0 = vsel %vm2672_vm11, %v594_v43, %v596_v53  ;;  %v563_v1 = vsel %vm2670_vm13, %v558_v25, %v560_v63  ;;  %v615_v3 = vpop.permute.xlu2 %614  ;;  %vm2674_vm13 = vcmask 637952  }
 0x196   : > { %v604_v4 = vsel %vm280_vm5, %v600_v0, 0.0  ;;  %v567_v5 = vsel %vm305_vm14, %v563_v1, 0.0 }
 0x197   : > { %v607_v6 = vmul.f32 %v606_v62, %v604_v4  ;;  %v570_v7 = vmul.f32 %v568_v30, %v567_v5 }
 0x199   : > { %v609_v47 = vadd.f32 %v607_v6, %v590_v61  ;;  %v572_v8 = vadd.f32 %v570_v7, %v553_v60  ;;  %v644_v25 = vstv %s2168_s5  ;;  %s2301_s5 = sld [smem:[#allocation6 + $0x1b]] }
 0x19a   : > { %883 = vrot.lane.b32.xlu1 %v2085_v2, %s1663_s8  ;;  %851 = vrot.lane.b32.xlu0 %v2117_v45, %s1661_s6 }
 0x19b   : > { %849 = vrot.lane.b32.xlu2 %v1882_v49, %s1661_s6  ;;  %s2184_s6 = sld [smem:[#allocation6 + $0x12]] }
 0x19c   : > { %v613_v13 = vpop.permute.xlu1 %612  ;;  %v579_v14 = vpop.permute.xlu0 %578 }
 0x19d   : > { %v619_v15 = vsel %vm2673_vm0, %v613_v13, %v615_v3  ;;  %v582_v16 = vsel %vm2671_vm2, %v577_v34, %v579_v14  ;;  %v634_v17 = vpop.permute.xlu2 %633  ;;  %vm2675_vm2 = vcmask 629760  }
 0x19e   : > { %v623_v18 = vsel %vm288_vm4, %v619_v15, 0.0  ;;  %v586_v19 = vsel %vm313_vm1, %v582_v16, 0.0 }
 0x19f   : > { %v626_v20 = vmul.f32 %v625_v10, %v623_v18  ;;  %v589_v21 = vmul.f32 %v587_v42, %v586_v19 }
 0x1a1   : > { %v628_v23 = vadd.f32 %v626_v20, %v609_v47  ;;  %v591_v24 = vadd.f32 %v589_v21, %v572_v8  ;;  %v663_v34 = vstv %s2184_s6  ;;  %s2317_s6 = sld [smem:[#allocation6 + $0x1c]] }
 0x1a2   : > { %901 = vrot.lane.b32.xlu1 %v2085_v2, %s1664_s14  ;;  %869 = vrot.lane.b32.xlu0 %v2117_v45, %s1662_s7 }
 0x1a3   : > { %867 = vrot.lane.b32.xlu2 %v1882_v49, %s1662_s7  ;;  %s2197_s7 = sld [smem:[#allocation6 + $0x13]] }
 0x1a4   : > { %v632_v26 = vpop.permute.xlu1 %631  ;;  %v598_v27 = vpop.permute.xlu0 %597 }
 0x1a5   : > { %v638_v46 = vsel %vm2674_vm13, %v632_v26, %v634_v17  ;;  %v601_v28 = vsel %vm2672_vm11, %v596_v53, %v598_v27  ;;  %v653_v29 = vpop.permute.xlu2 %652  ;;  %vm2676_vm11 = vcmask 621568  }
 0x1a6   : > { %v645_v30 = vmul.f32 %v644_v25, %v638_v46  ;;  %v605_v31 = vsel %vm281_vm10, %v601_v28, 0.0 }
 0x1a7   : > { %v608_v32 = vmul.f32 %v606_v62, %v605_v31 }
 0x1a8   : > { %v647_v48 = vadd.f32 %v645_v30, %v628_v23 }
 0x1a9   : > { %v610_v33 = vadd.f32 %v608_v32, %v591_v24  ;;  %v682_v53 = vstv %s2197_s7  ;;  %s2687_s7 = smov 78  }
 0x1aa   : > { %919 = vrot.lane.b32.xlu1 %v2085_v2, %s1665_s17  ;;  %887 = vrot.lane.b32.xlu0 %v2117_v45, %s1663_s8 }
 0x1ab   : > { %885 = vrot.lane.b32.xlu2 %v1882_v49, %s1663_s8  ;;  %s2212_s8 = sld [smem:[#allocation6 + $0x14]] }
 0x1ac   : > { %v651_v35 = vpop.permute.xlu1 %650  ;;  %v617_v36 = vpop.permute.xlu0 %616 }
 0x1ad   : > { %v657_v38 = vsel %vm2675_vm2, %v651_v35, %v653_v29  ;;  %v620_v39 = vsel %vm2673_vm0, %v615_v3, %v617_v36  ;;  %v672_v40 = vpop.permute.xlu2 %671  ;;  %vm2677_vm0 = vcmask 523264  }
 0x1ae   : > { %v661_v41 = vsel %vm304_vm8, %v657_v38, 0.0  ;;  %v624_v42 = vsel %vm289_vm9, %v620_v39, 0.0 }
 0x1af   : > { %v664_v44 = vmul.f32 %v663_v34, %v661_v41  ;;  %v627_v50 = vmul.f32 %v625_v10, %v624_v42 }
 0x1b1   : > { %v666_v51 = vadd.f32 %v664_v44, %v647_v48  ;;  %v629_v52 = vadd.f32 %v627_v50, %v610_v33  ;;  %v701_v3 = vstv %s2212_s8  ;;  %s2333_s8 = sld [smem:[#allocation6 + $0x1d]] }
 0x1b2   : > { %937 = vrot.lane.b32.xlu1 %v2085_v2, %s1666_s18  ;;  %905 = vrot.lane.b32.xlu0 %v2117_v45, %s1664_s14 }
 0x1b3   : > { %903 = vrot.lane.b32.xlu2 %v1882_v49, %s1664_s14  ;;  %s2225_s14 = sld [smem:[#allocation6 + $0x15]] }
 0x1b4   : > { %v670_v54 = vpop.permute.xlu1 %669  ;;  %v636_v55 = vpop.permute.xlu0 %635 }
 0x1b5   : > { %v676_v59 = vsel %vm2676_vm11, %v670_v54, %v672_v40  ;;  %v639_v60 = vsel %vm2674_vm13, %v634_v17, %v636_v55  ;;  %v691_v61 = vpop.permute.xlu2 %690  ;;  %vm713_vm13 = vcmask 515072  }
 0x1b6   : > { %v680_v62 = vsel %vm312_vm12, %v676_v59, 0.0  ;;  %v646_v43 = vmul.f32 %v644_v25, %v639_v60 }
 0x1b7   : > { %v683_v63 = vmul.f32 %v682_v53, %v680_v62 }
 0x1b8   : > { %v648_v0 = vadd.f32 %v646_v43, %v629_v52 }
 0x1b9   : > { %v685_v1 = vadd.f32 %v683_v63, %v666_v51  ;;  %v720_v17 = vstv %s2225_s14  ;;  %s2688_s14 = smov 77  }
 0x1ba   : > { %955 = vrot.lane.b32.xlu1 %v2085_v2, %s1667_s19  ;;  %923 = vrot.lane.b32.xlu0 %v2117_v45, %s1665_s17 }
 0x1bb   : > { %921 = vrot.lane.b32.xlu2 %v1882_v49, %s1665_s17  ;;  %s2239_s17 = sld [smem:[#allocation6 + $0x16]] }
 0x1bc   : > { %v689_v4 = vpop.permute.xlu1 %688  ;;  %v655_v5 = vpop.permute.xlu0 %654 }
 0x1bd   : > { %v695_v6 = vsel %vm2677_vm0, %v689_v4, %v691_v61  ;;  %v658_v7 = vsel %vm2675_vm2, %v653_v29, %v655_v5  ;;  %v710_v47 = vpop.permute.xlu2 %709  ;;  %vm732_vm2 = vcmask 506880  }
 0x1be   : > { %v699_v8 = vsel %vm280_vm5, %v695_v6, 0.0  ;;  %v662_v10 = vsel %vm305_vm14, %v658_v7, 0.0 }
 0x1bf   : > { %v702_v13 = vmul.f32 %v701_v3, %v699_v8  ;;  %v665_v14 = vmul.f32 %v663_v34, %v662_v10  ;;  %v785_v8 = vstv %s2280_s15  ;;  %v805_v10 = vstv %s2285_s4  ;;  %s2391_s15 = sld [smem:[#allocation6 + $0x21]] }
 0x1c0   : > { %s2404_s4 = sld [smem:[#allocation6 + $0x22]] }
 0x1c1   : > { %v704_v15 = vadd.f32 %v702_v13, %v685_v1  ;;  %v667_v16 = vadd.f32 %v665_v14, %v648_v0  ;;  %v739_v29 = vstv %s2239_s17  ;;  %s2348_s17 = sld [smem:[#allocation6 + $0x1e]] }
 0x1c2   : > { %973 = vrot.lane.b32.xlu1 %v2085_v2, %s1668_s22  ;;  %941 = vrot.lane.b32.xlu0 %v2117_v45, %s1666_s18 }
 0x1c3   : > { %939 = vrot.lane.b32.xlu2 %v1882_v49, %s1666_s18  ;;  %s2683_s18 = smov 94  }
 0x1c4   : > { %v708_v18 = vpop.permute.xlu1 %707  ;;  %v674_v19 = vpop.permute.xlu0 %673 }
 0x1c5   : > { %v714_v20 = vsel %vm713_vm13, %v708_v18, %v710_v47  ;;  %v677_v21 = vsel %vm2676_vm11, %v672_v40, %v674_v19  ;;  %v729_v23 = vpop.permute.xlu2 %728  ;;  %vm751_vm11 = vcmask 498688   ;;  %v758_v40 = vstv %s2255_s29  ;;  %s2361_s29 = sld [smem:[#allocation6 + $0x1f]] }
 0x1c6   : > { %v718_v24 = vsel %vm288_vm4, %v714_v20, 0.0  ;;  %v681_v25 = vsel %vm313_vm1, %v677_v21, 0.0 }
 0x1c7   : > { %v721_v26 = vmul.f32 %v720_v17, %v718_v24  ;;  %v684_v27 = vmul.f32 %v682_v53, %v681_v25 }
 0x1c9   : > { %v723_v46 = vadd.f32 %v721_v26, %v704_v15  ;;  %v686_v28 = vadd.f32 %v684_v27, %v667_v16  ;;  %v823_v27 = vstv %s2301_s5  ;;  %s2444_s5 = sld [smem:[#allocation6 + $0x25]] }
 0x1ca   : > { %991 = vrot.lane.b32.xlu1 %v2085_v2, %s2683_s18  ;;  %959 = vrot.lane.b32.xlu0 %v2117_v45, %s1667_s19 }
 0x1cb   : > { %957 = vrot.lane.b32.xlu2 %v1882_v49, %s1667_s19  ;;  %s2268_s19 = sld [smem:[#allocation6 + $0x18]] }
 0x1cc   : > { %v727_v30 = vpop.permute.xlu1 %726  ;;  %v693_v31 = vpop.permute.xlu0 %692 }
 0x1cd   : > { %v733_v32 = vsel %vm732_vm2, %v727_v30, %v729_v23  ;;  %v696_v48 = vsel %vm2677_vm0, %v691_v61, %v693_v31  ;;  %v748_v33 = vpop.permute.xlu2 %747  ;;  %vm770_vm0 = vcmask 490496  }
 0x1ce   : > { %v740_v34 = vmul.f32 %v739_v29, %v733_v32  ;;  %v700_v35 = vsel %vm281_vm10, %v696_v48, 0.0 }
 0x1cf   : > { %v703_v36 = vmul.f32 %v701_v3, %v700_v35 }
 0x1d0   : > { %v742_v38 = vadd.f32 %v740_v34, %v723_v46 }
 0x1d1   : > { %v705_v39 = vadd.f32 %v703_v36, %v686_v28  ;;  %v777_v61 = vstv %s2268_s19  ;;  %v784_v36 = vsel %vm281_vm10, %v1882_v49, 0.0  ;;  %s2692_s19 = smov 64  }
 0x1d2   : > { %1009 = vrot.lane.b32.xlu1 %v2085_v2, %s1670_s24  ;;  %977 = vrot.lane.b32.xlu0 %v2117_v45, %s1668_s22 }
 0x1d3   : > { %975 = vrot.lane.b32.xlu2 %v1882_v49, %s1668_s22  ;;  %s2684_s22 = smov 92  }
 0x1d4   : > { %v746_v41 = vpop.permute.xlu1 %745  ;;  %v712_v42 = vpop.permute.xlu0 %711 }
 0x1d5   : > { %v752_v44 = vsel %vm751_vm11, %v746_v41, %v748_v33  ;;  %v715_v50 = vsel %vm713_vm13, %v710_v47, %v712_v42  ;;  %v767_v51 = vpop.permute.xlu2 %766  ;;  %v783_v47 = vsel %vm280_vm5, %v2085_v2, 0.0  ;;  %v787_v42 = vmul.f32 %v785_v8, %v784_v36 }
 0x1d6   : > { %v756_v52 = vsel %vm304_vm8, %v752_v44, 0.0  ;;  %v719_v53 = vsel %vm289_vm9, %v715_v50, 0.0  ;;  %v786_v15 = vmul.f32 %v785_v8, %v783_v47  ;;  %v877_v47 = vstv %s2348_s17  ;;  %s2530_s17 = sld [smem:[#allocation6 + $0x2e]] }
 0x1d7   : > { %v759_v54 = vmul.f32 %v758_v40, %v756_v52  ;;  %v722_v55 = vmul.f32 %v720_v17, %v719_v53 }
 0x1d9   : > { %v761_v59 = vadd.f32 %v759_v54, %v742_v38  ;;  %v724_v60 = vadd.f32 %v722_v55, %v705_v39  ;;  %v841_v38 = vstv %s2317_s6  ;;  %s2496_s6 = sld [smem:[#allocation6 + $0x2a]] }
 0x1da   : > { %1029 = vrot.lane.b32.xlu1 %v1882_v49, %s2684_s22  ;;  %995 = vrot.lane.b32.xlu0 %v2117_v45, %s2683_s18 }
 0x1db   : > { %993 = vrot.lane.b32.xlu2 %v1882_v49, %s2683_s18  ;;  %s2690_s18 = smov 76  }
 0x1dc   : > { %v765_v62 = vpop.permute.xlu1 %764  ;;  %v731_v43 = vpop.permute.xlu0 %730 }
 0x1dd   : > { %v771_v63 = vsel %vm770_vm0, %v765_v62, %v767_v51  ;;  %v734_v0 = vsel %vm732_vm2, %v729_v23, %v731_v43  ;;  %v796_v1 = vpop.permute.xlu2 %795 }
 0x1de   : > { %v775_v3 = vsel %vm312_vm12, %v771_v63, 0.0  ;;  %v741_v4 = vmul.f32 %v739_v29, %v734_v0 }
 0x1df   : > { %v778_v5 = vmul.f32 %v777_v61, %v775_v3 }
 0x1e0   : > { %v743_v6 = vadd.f32 %v741_v4, %v724_v60 }
 0x1e1   : > { %v780_v7 = vadd.f32 %v778_v5, %v761_v59 }
 0x1e2   : > { %1047 = vrot.lane.b32.xlu1 %v1882_v49, %s2685_s20  ;;  %1013 = vrot.lane.b32.xlu0 %v2117_v45, %s1670_s24 }
 0x1e3   : > { %1011 = vrot.lane.b32.xlu2 %v1882_v49, %s1670_s24  ;;  %v788_v21 = vadd.f32 %v786_v15, %v780_v7  ;;  %s2686_s24 = smov 79  }
 0x1e4   : > { %v794_v13 = vpop.permute.xlu1 %793  ;;  %v750_v14 = vpop.permute.xlu0 %749 }
 0x1e5   : > { %v799_v16 = vsel %vm333_vm3, %v794_v13, %v796_v1  ;;  %v753_v17 = vsel %vm751_vm11, %v748_v33, %v750_v14  ;;  %v814_v18 = vpop.permute.xlu2 %813 }
 0x1e6   : > { %v803_v19 = vsel %vm288_vm4, %v799_v16, 0.0  ;;  %v757_v20 = vsel %vm305_vm14, %v753_v17, 0.0 }
 0x1e7   : > { %v806_v23 = vmul.f32 %v805_v10, %v803_v19  ;;  %v760_v24 = vmul.f32 %v758_v40, %v757_v20 }
 0x1e9   : > { %v808_v25 = vadd.f32 %v806_v23, %v788_v21  ;;  %v762_v26 = vadd.f32 %v760_v24, %v743_v6  ;;  %v895_v23 = vstv %s2361_s29  ;;  %s2554_s29 = sld [smem:[#allocation6 + $0x30]] }
 0x1ea   : > { %1065 = vrot.lane.b32.xlu1 %v1882_v49, %s2686_s24  ;;  %1027 = vrot.lane.b32.xlu0 %v2085_v2, %s2684_s22 }
 0x1eb   : > { %1031 = vrot.lane.b32.xlu2 %v2117_v45, %s2684_s22  ;;  %s2375_s22 = sld [smem:[#allocation6 + $0x20]] }
 0x1ec   : > { %v812_v46 = vpop.permute.xlu1 %811  ;;  %v769_v28 = vpop.permute.xlu0 %768 }
 0x1ed   : > { %v817_v29 = vsel %vm352_vm6, %v812_v46, %v814_v18  ;;  %v772_v30 = vsel %vm770_vm0, %v767_v51, %v769_v28  ;;  %v832_v31 = vpop.permute.xlu2 %831 }
 0x1ee   : > { %v824_v32 = vmul.f32 %v823_v27, %v817_v29  ;;  %v776_v48 = vsel %vm313_vm1, %v772_v30, 0.0 }
 0x1ef   : > { %v779_v33 = vmul.f32 %v777_v61, %v776_v48  ;;  %v859_v61 = vstv %s2333_s8  ;;  %s2515_s8 = sld [smem:[#allocation6 + $0x2c]] }
 0x1f0   : > { %v826_v34 = vadd.f32 %v824_v32, %v808_v25 }
 0x1f1   : > { %v781_v35 = vadd.f32 %v779_v33, %v762_v26  ;;  %v913_v33 = vstv %s2375_s22  ;;  %s1444_s22 = sshll.u32 %s1718_s13, 3 }
 0x1f2   : > { %1083 = vrot.lane.b32.xlu1 %v1882_v49, %s2687_s7  ;;  %1045 = vrot.lane.b32.xlu0 %v2085_v2, %s2685_s20 }
 0x1f3   : > { %1049 = vrot.lane.b32.xlu2 %v2117_v45, %s2685_s20  ;;  %v789_v54 = vadd.f32 %v787_v42, %v781_v35  ;;  %s2419_s20 = sld [smem:[#allocation6 + $0x23]] }
 0x1f4   : > { %v830_v39 = vpop.permute.xlu1 %829  ;;  %v798_v40 = vpop.permute.xlu0 %797 }
 0x1f5   : > { %v835_v41 = vsel %vm371_vm7, %v830_v39, %v832_v31  ;;  %v800_v44 = vsel %vm333_vm3, %v796_v1, %v798_v40  ;;  %v850_v50 = vpop.permute.xlu2 %849  ;;  %vm2689_vm3 = vcmask 1014784  }
 0x1f6   : > { %v839_v51 = vsel %vm304_vm8, %v835_v41, 0.0  ;;  %v804_v52 = vsel %vm289_vm9, %v800_v44, 0.0 }
 0x1f7   : > { %v842_v53 = vmul.f32 %v841_v38, %v839_v51  ;;  %v807_v55 = vmul.f32 %v805_v10, %v804_v52  ;;  %v931_v51 = vstv %s2391_s15 }
 0x1f9   : > { %v844_v59 = vadd.f32 %v842_v53, %v826_v34  ;;  %v809_v60 = vadd.f32 %v807_v55, %v789_v54 }
 0x1fa   : > { %1103 = vrot.lane.b32.xlu1 %v2117_v45, %s2688_s14  ;;  %1063 = vrot.lane.b32.xlu0 %v2085_v2, %s2686_s24 }
 0x1fb   : > { %1067 = vrot.lane.b32.xlu2 %v2117_v45, %s2686_s24  ;;  %s2493_s24 = sld [smem:[#allocation6 + $0x29]] }
 0x1fc   : > { %v848_v62 = vpop.permute.xlu1 %847  ;;  %v816_v43 = vpop.permute.xlu0 %815 }
 0x1fd   : > { %v853_v63 = vsel %vm2689_vm3, %v848_v62, %v850_v50  ;;  %v818_v0 = vsel %vm352_vm6, %v814_v18, %v816_v43  ;;  %v868_v1 = vpop.permute.xlu2 %867  ;;  %vm2691_vm6 = vcmask 916480  }
 0x1fe   : > { %v857_v3 = vsel %vm312_vm12, %v853_v63, 0.0  ;;  %v825_v4 = vmul.f32 %v823_v27, %v818_v0 }
 0x1ff   : > { %v860_v5 = vmul.f32 %v859_v61, %v857_v3 }
 0x200   : > { %v827_v6 = vadd.f32 %v825_v4, %v809_v60 }
 0x201   : > { %v862_v7 = vadd.f32 %v860_v5, %v844_v59 }
 0x202   : > { %1119 = vrot.lane.b32.xlu1 %v1882_v49, %s2690_s18  ;;  %1101 = vrot.lane.b32.xlu0 %v1882_v49, %s2688_s14 }
 0x203   : > { %1085 = vrot.lane.b32.xlu2 %v2117_v45, %s2687_s7 }
 0x204   : > { %v866_v8 = vpop.permute.xlu1 %865  ;;  %v834_v10 = vpop.permute.xlu0 %833 }
 0x205   : > { %v871_v13 = vsel %vm2691_vm6, %v866_v8, %v868_v1  ;;  %v836_v14 = vsel %vm371_vm7, %v832_v31, %v834_v10  ;;  %v886_v15 = vpop.permute.xlu2 %885  ;;  %vm2693_vm7 = vcmask 908288   ;;  %vm2694_vm6 = vcmask 900096  }
 0x206   : > { %v875_v16 = vsel %vm280_vm5, %v871_v13, 0.0  ;;  %v840_v17 = vsel %vm305_vm14, %v836_v14, 0.0 }
 0x207   : > { %v878_v18 = vmul.f32 %v877_v47, %v875_v16  ;;  %v843_v19 = vmul.f32 %v841_v38, %v840_v17 }
 0x209   : > { %v880_v20 = vadd.f32 %v878_v18, %v862_v7  ;;  %v845_v21 = vadd.f32 %v843_v19, %v827_v6 }
 0x20a   : > { %1137 = vrot.lane.b32.xlu1 %v1882_v49, %s2692_s19  ;;  %1099 = vrot.lane.b32.xlu0 %v2085_v2, %s2688_s14  ;;  %s2522_s14 = sld [smem:[#allocation6 + $0x2d]] }
 0x20b   : > { %1081 = vrot.lane.b32.xlu2 %v2085_v2, %s2687_s7  ;;  %s2505_s7 = sld [smem:[#allocation6 + $0x2b]] }
 0x20c   : > { %v884_v24 = vpop.permute.xlu1 %883  ;;  %v852_v25 = vpop.permute.xlu0 %851 }
 0x20d   : > { %v889_v26 = vsel %vm2693_vm7, %v884_v24, %v886_v15  ;;  %v854_v27 = vsel %vm2689_vm3, %v850_v50, %v852_v25  ;;  %v904_v46 = vpop.permute.xlu2 %903  ;;  %vm2695_vm7 = vcmask 916480   ;;  %vm2696_vm3 = vcmask 891904  }
 0x20e   : > { %v893_v28 = vsel %vm288_vm4, %v889_v26, 0.0  ;;  %v858_v29 = vsel %vm313_vm1, %v854_v27, 0.0 }
 0x20f   : > { %v896_v30 = vmul.f32 %v895_v23, %v893_v28  ;;  %v861_v31 = vmul.f32 %v859_v61, %v858_v29 }
 0x211   : > { %v898_v32 = vadd.f32 %v896_v30, %v880_v20  ;;  %v863_v48 = vadd.f32 %v861_v31, %v845_v21 }
 0x212   : > { %1155 = vrot.lane.b32.xlu1 %v1882_v49, %s1678_s30  ;;  %1117 = vrot.lane.b32.xlu0 %v2085_v2, %s2690_s18 }
 0x213   : > { %1121 = vrot.lane.b32.xlu2 %v2117_v45, %s2690_s18  ;;  %s2535_s18 = sld [smem:[#allocation6 + $0x2f]] }
 0x214   : > { %v902_v34 = vpop.permute.xlu1 %901  ;;  %v870_v35 = vpop.permute.xlu0 %869 }
 0x215   : > { %v907_v36 = vsel %vm2694_vm6, %v902_v34, %v904_v46  ;;  %v872_v38 = vsel %vm2695_vm7, %v868_v1, %v870_v35  ;;  %v922_v39 = vpop.permute.xlu2 %921  ;;  %vm2697_vm6 = vcmask 908288   ;;  %v949_v1 = vstv %s2404_s4 }
 0x216   : > { %v914_v40 = vmul.f32 %v913_v33, %v907_v36  ;;  %v876_v41 = vsel %vm281_vm10, %v872_v38, 0.0  ;;  %vm2698_vm7 = vcmask 883712   ;;  %v1003_v38 = vstv %s2444_s5 }
 0x217   : > { %v879_v42 = vmul.f32 %v877_v47, %v876_v41 }
 0x218   : > { %v916_v44 = vadd.f32 %v914_v40, %v898_v32 }
 0x219   : > { %v881_v50 = vadd.f32 %v879_v42, %v863_v48 }
 0x21a   : > { %1173 = vrot.lane.b32.xlu1 %v1882_v49, %s1679_s28  ;;  %1135 = vrot.lane.b32.xlu0 %v2085_v2, %s2692_s19 }
 0x21b   : > { %1139 = vrot.lane.b32.xlu2 %v2117_v45, %s2692_s19  ;;  %s2561_s19 = sld [smem:[#allocation6 + $0x31]] }
 0x21c   : > { %v920_v52 = vpop.permute.xlu1 %919  ;;  %v888_v53 = vpop.permute.xlu0 %887 }
 0x21d   : > { %v925_v54 = vsel %vm2696_vm3, %v920_v52, %v922_v39  ;;  %v890_v55 = vsel %vm2697_vm6, %v886_v15, %v888_v53  ;;  %v940_v59 = vpop.permute.xlu2 %939  ;;  %vm2699_vm3 = vcmask 900096   ;;  %v967_v15 = vstv %s2419_s20  ;;  %s1289_s20 = scalar_lea.hbm %s2643_s2, %s1444_s22 }
 0x21e   : > { %v929_v60 = vsel %vm304_vm8, %v925_v54, 0.0  ;;  %v894_v61 = vsel %vm289_vm9, %v890_v55, 0.0  ;;  %vm2700_vm6 = vcmask 891904  }
 0x21f   : > { %v932_v62 = vmul.f32 %v931_v51, %v929_v60  ;;  %v897_v43 = vmul.f32 %v895_v23, %v894_v61 }
 0x221   : > { %v934_v63 = vadd.f32 %v932_v62, %v916_v44  ;;  %v899_v0 = vadd.f32 %v897_v43, %v881_v50 }
 0x222   : > { %1193 = vrot.lane.b32.xlu1 %v2117_v45, %s1680_s23  ;;  %1153 = vrot.lane.b32.xlu0 %v2085_v2, %s1678_s30 }
 0x223   : > { %1157 = vrot.lane.b32.xlu2 %v2117_v45, %s1678_s30  ;;  %s2432_s30 = sld [smem:[#allocation6 + $0x24]] }
 0x224   : > { %v938_v3 = vpop.permute.xlu1 %937  ;;  %v906_v4 = vpop.permute.xlu0 %905 }
 0x225   : > { %v943_v5 = vsel %vm2698_vm7, %v938_v3, %v940_v59  ;;  %v908_v6 = vsel %vm2699_vm3, %v904_v46, %v906_v4  ;;  %v958_v7 = vpop.permute.xlu2 %957  ;;  %vm2701_vm7 = vcmask 777216   ;;  %vm2702_vm3 = vcmask 883712  }
 0x226   : > { %v947_v47 = vsel %vm312_vm12, %v943_v5, 0.0  ;;  %v915_v8 = vmul.f32 %v913_v33, %v908_v6 }
 0x227   : > { %v950_v10 = vmul.f32 %v949_v1, %v947_v47 }
 0x228   : > { %v917_v13 = vadd.f32 %v915_v8, %v899_v0 }
 0x229   : > { %v952_v14 = vadd.f32 %v950_v10, %v934_v63  ;;  %v985_v27 = vstv %s2432_s30  ;;  %s2722_s30 = sshll.u32 %s1790_s27, 3 }
 0x22a   : > { %1209 = vrot.lane.b32.xlu1 %v1882_v49, %s1681_s3  ;;  %1191 = vrot.lane.b32.xlu0 %v1882_v49, %s1680_s23  ;;  %s175_s5 = scalar_lea.vmem [#allocation7], %s2722_s30 }
 0x22b   : > { %1175 = vrot.lane.b32.xlu2 %v2117_v45, %s1679_s28  ;;  %s1291_s13 = sshll.u32 %s175_s5, 4  ;;  %s1292_s13 = int_to_ptr.vmem [resolvable:$true] %s1291_s13 }
 0x22c   : > { %v956_v16 = vpop.permute.xlu1 %955  ;;  %v924_v17 = vpop.permute.xlu0 %923 }
 0x22d   : > { %v961_v18 = vsel %vm504_vm15, %v956_v16, %v958_v7  ;;  %v926_v19 = vsel %vm2700_vm6, %v922_v39, %v924_v17  ;;  %v976_v20 = vpop.permute.xlu2 %975  ;;  %vm2703_vm6 = vcmask 769024  }
 0x22e   : > { %v965_v21 = vsel %vm280_vm5, %v961_v18, 0.0  ;;  %v930_v49 = vsel %vm305_vm14, %v926_v19, 0.0 }
 0x22f   : > { %v968_v23 = vmul.f32 %v967_v15, %v965_v21  ;;  %v933_v24 = vmul.f32 %v931_v51, %v930_v49 }
 0x231   : > { %v970_v25 = vadd.f32 %v968_v23, %v952_v14  ;;  %v935_v26 = vadd.f32 %v933_v24, %v917_v13 }
 0x232   : > { %1189 = vrot.lane.b32.xlu0 %v2085_v2, %s1680_s23  ;;  %s2491_s23 = sld [smem:[#allocation6 + $0x28]] }
 0x233   : > { %1171 = vrot.lane.b32.xlu2 %v2085_v2, %s1679_s28  ;;  %s2458_s28 = sld [smem:[#allocation6 + $0x26]] }
 0x234   : > { %v974_v46 = vpop.permute.xlu1 %973  ;;  %v942_v28 = vpop.permute.xlu0 %941 }
 0x235   : > { %v979_v29 = vsel %vm2701_vm7, %v974_v46, %v976_v20  ;;  %v944_v30 = vsel %vm2702_vm3, %v940_v59, %v942_v28  ;;  %v994_v31 = vpop.permute.xlu2 %993  ;;  %vm2704_vm7 = vcmask 760832   ;;  %vm2705_vm3 = vcmask 777216  }
 0x236   : > { %v983_v32 = vsel %vm288_vm4, %v979_v29, 0.0  ;;  %v948_v48 = vsel %vm313_vm1, %v944_v30, 0.0 }
 0x237   : > { %v986_v33 = vmul.f32 %v985_v27, %v983_v32  ;;  %v951_v34 = vmul.f32 %v949_v1, %v948_v48 }
 0x239   : > { %v988_v35 = vadd.f32 %v986_v33, %v970_v25  ;;  %v953_v36 = vadd.f32 %v951_v34, %v935_v26  ;;  %v1021_v54 = vstv %s2458_s28  ;;  %s1293_s28 = sshll.u32 %s1289_s20, 4  ;;  %s1294_s28 = int_to_ptr.hbm [resolvable:$true] %s1293_s28 }
 0x23a   : > { %1207 = vrot.lane.b32.xlu0 %v2085_v2, %s1681_s3 }
 0x23b   : > { %1211 = vrot.lane.b32.xlu2 %v2117_v45, %s1681_s3  ;;  %s2489_s3 = sld [smem:[#allocation6 + $0x27]] }
 0x23c   : > { %v992_v39 = vpop.permute.xlu1 %991  ;;  %v960_v40 = vpop.permute.xlu0 %959 }
 0x23d   : > { %v997_v41 = vsel %vm2703_vm6, %v992_v39, %v994_v31  ;;  %v962_v42 = vsel %vm504_vm15, %v958_v7, %v960_v40  ;;  %v1012_v44 = vpop.permute.xlu2 %1011  ;;  %vm2706_vm15 = vmmov %vm2703_vm6 }
 0x23e   : > { %v1004_v50 = vmul.f32 %v1003_v38, %v997_v41  ;;  %v966_v51 = vsel %vm281_vm10, %v962_v42, 0.0  ;;  %vm2707_vm6 = vmmov %vm2704_vm7  ;;  %v1057_v42 = vstv %s2491_s23  ;;  %s1597_s23 = sshra.s32 %s1294_s28, 4  ;;  %s1598_s23 = int_to_ptr.hbm [resolvable:$true] %s1597_s23 }
 0x23f   : > { %v969_v52 = vmul.f32 %v967_v15, %v966_v51  ;;  %p1604_p9 = scmp.lt.s32.totalorder %s1598_s23, %s2643_s2 }
 0x240   : > { %v1006_v2 = vadd.f32 %v1004_v50, %v988_v35  ;;  %v1075_v50 = vstv %s2493_s24  ;;  %s1599_s24 = scalar_lea.hbm %s1598_s23, 8 }
 0x241   : > { %v971_v53 = vadd.f32 %v969_v52, %v953_v36  ;;  %v1039_v35 = vstv %s2489_s3  ;;  %s1278_s3 = scalar_lea.sflag [#allocation4], %s1790_s27  ;;  %p1600_p1 = scmp.ne.s32.totalorder %s1598_s23, %s1599_s24 }
 0x243   : > { %p1601_p4 = pnand %p1600_p1, %p1763_p3 }
 0x244   : > { %v1010_v45 = vpop.permute.xlu1 %1009  ;;  %v978_v55 = vpop.permute.xlu0 %977 }
 0x245   : > { %v1015_v59 = vsel %vm2704_vm7, %v1010_v45, %v1012_v44  ;;  %v980_v60 = vsel %vm2705_vm3, %v976_v20, %v978_v55  ;;  %v1032_v61 = vpop.permute.xlu2 %1031  ;;  %vm2708_vm7 = vcmask 752640   ;;  %vm2709_vm3 = vcmask 654336   ;;  %p1602_p8 = pneg %p1601_p4 }
 0x246   : > { %v1019_v62 = vsel %vm304_vm8, %v1015_v59, 0.0  ;;  %v984_v43 = vsel %vm289_vm9, %v980_v60, 0.0 }
 0x247   : > { %v1022_v63 = vmul.f32 %v1021_v54, %v1019_v62  ;;  %v987_v0 = vmul.f32 %v985_v27, %v984_v43  ;;  %v1111_v62 = vstv %s2505_s7 }
 0x249   : > { %v2471_v1 = vadd.f32 %v1022_v63, %v1006_v2  ;;  %v989_v3 = vadd.f32 %v987_v0, %v971_v53  ;;  %v1093_v53 = vstv %s2496_s6 }
 0x24c   : > { %v1030_v4 = vpop.permute.xlu1 %1029  ;;  %v996_v5 = vpop.permute.xlu0 %995 }
 0x24d   : > { %v998_v6 = vsel %vm2706_vm15, %v994_v31, %v996_v5  ;;  %v1050_v7 = vpop.permute.xlu2 %1049  ;;  %v1034_v48 = vsel %vm2708_vm7, %v1030_v4, %v1032_v61  ;;  %vm2710_vm15 = vcmask 646144   ;;  %vm2712_vm7 = vcmask 637952  }
 0x24e   : > { %v1005_v47 = vmul.f32 %v1003_v38, %v998_v6  ;;  %v1038_v36 = vsel %vm313_vm1, %v1034_v48, 0.0 }
 0x24f   : > { %v1041_v41 = vmul.f32 %v1039_v35, %v1038_v36 }
 0x250   : > { %v1007_v8 = vadd.f32 %v1005_v47, %v989_v3 }
 0x254   : > { %v1048_v10 = vpop.permute.xlu1 %1047  ;;  %v1014_v13 = vpop.permute.xlu0 %1013 }
 0x255   : > { %v1016_v14 = vsel %vm2707_vm6, %v1012_v44, %v1014_v13  ;;  %v1068_v15 = vpop.permute.xlu2 %1067  ;;  %v1052_v38 = vsel %vm2709_vm3, %v1048_v10, %v1050_v7  ;;  %vm2711_vm6 = vcmask 629760   ;;  %vm2713_vm3 = vcmask 752640  }
 0x256   : > { %v1020_v16 = vsel %vm305_vm14, %v1016_v14, 0.0  ;;  %v1056_v44 = vsel %vm281_vm10, %v1052_v38, 0.0  ;;  %v1183_v38 = vstv %s2535_s18 }
 0x257   : > { %v1023_v17 = vmul.f32 %v1021_v54, %v1020_v16  ;;  %v1059_v59 = vmul.f32 %v1057_v42, %v1056_v44 }
 0x259   : > { %v1025_v18 = vadd.f32 %v1023_v17, %v1007_v8 }
 0x25b   : > { %v1043_v52 = vadd.f32 %v1041_v41, %v1025_v18 }
 0x25c   : > { %v1066_v19 = vpop.permute.xlu1 %1065  ;;  %v1028_v20 = vpop.permute.xlu0 %1027 }
 0x25d   : > { %v1086_v21 = vpop.permute.xlu2 %1085  ;;  %v1070_v39 = vsel %vm2710_vm15, %v1066_v19, %v1068_v15  ;;  %v1033_v61 = vsel %vm2713_vm3, %v1028_v20, %v1030_v4  ;;  %v1061_v63 = vadd.f32 %v1059_v59, %v1043_v52  ;;  %vm2714_vm15 = vcmask 654336  }
 0x25e   : > { %v1074_v51 = vsel %vm289_vm9, %v1070_v39, 0.0  ;;  %v1037_v3 = vsel %vm312_vm12, %v1033_v61, 0.0  ;;  %vm2717_vm3 = vcmask 646144   ;;  %v1147_v20 = vstv %s2522_s14 }
 0x25f   : > { %v1077_v60 = vmul.f32 %v1075_v50, %v1074_v51  ;;  %v1040_v17 = vmul.f32 %v1039_v35, %v1037_v3  ;;  %v1201_v59 = vstv %s2554_s29 }
 0x261   : > { %v1079_v6 = vadd.f32 %v1077_v60, %v1061_v63  ;;  %v1042_v12 = vadd.f32 %v1040_v17, %v2471_v1 }
 0x264   : > { %v2477_v49 = vpop.permute.xlu1 %1083  ;;  %v1046_v23 = vpop.permute.xlu0 %1045 }
 0x265   : > { %v2479_v24 = vpop.permute.xlu2 %1081  ;;  %v1088_v54 = vsel %vm2712_vm7, %v2477_v49, %v1086_v21  ;;  %v1051_v5 = vsel %vm2714_vm15, %v1046_v23, %v1048_v10  ;;  %vm2716_vm7 = vcmask 523264   ;;  %v1129_v10 = vstv %s2515_s8  ;;  %s1603_s8 = scalar_lea.hbm %s2643_s2, 16 }
 0x266   : > { %v1095_v0 = vmul.f32 %v1093_v53, %v1088_v54  ;;  %v1055_v15 = vsel %vm280_vm5, %v1051_v5, 0.0  ;;  %p1605_p10 = scmp.lt.s32.totalorder %s1603_s8, %s1599_s24 }
 0x268   : > { %v1097_v14 = vadd.f32 %v1095_v0, %v1079_v6  ;;  %p1606_p2 = por %p1605_p10, %p1604_p9 }
 0x26a   : > { %p1607_p11 = pnand %p1606_p2, %p1602_p8 }
 0x26c   : > { %v1104_v25 = vpop.permute.xlu1 %1103  ;;  %v1064_v26 = vpop.permute.xlu0 %1063 }
 0x26d   : > { %v1122_v27 = vpop.permute.xlu2 %1121  ;;  %v1069_v13 = vsel %vm2717_vm3, %v1064_v26, %v1066_v19 }
 0x26e   : > { %v1073_v19 = vsel %vm288_vm4, %v1069_v13, 0.0 }
 0x26f   : > { %v1076_v36 = vmul.f32 %v1075_v50, %v1073_v19 }
 0x274   : > { %v2481_v46 = vpop.permute.xlu1 %1119  ;;  %v2483_v28 = vpop.permute.xlu0 %1101 }
 0x275   : > { %v1140_v29 = vpop.permute.xlu2 %1139  ;;  %v1106_v2 = vsel %vm2711_vm6, %v2483_v28, %v1104_v25  ;;  %vm2715_vm6 = vcmask 621568  }
 0x276   : > { %v1110_v43 = vsel %vm305_vm14, %v1106_v2, 0.0  ;;  %v1124_v4 = vsel %vm2715_vm6, %v2481_v46, %v1122_v27  ;;  %v1058_v27 = vmul.f32 %v1057_v42, %v1055_v15  ;;  %vm2720_vm15 = vmmov %vm2715_vm6 }
 0x277   : > { %v1113_v7 = vmul.f32 %v1111_v62, %v1110_v43  ;;  %v1128_v18 = vsel %vm313_vm1, %v1124_v4, 0.0  ;;  %vm2721_vm6 = vmmov %vm2716_vm7 }
 0x278   : > { %v1131_v48 = vmul.f32 %v1129_v10, %v1128_v18  ;;  %v1060_v51 = vadd.f32 %v1058_v27, %v1042_v12 }
 0x279   : > { %v1115_v26 = vadd.f32 %v1113_v7, %v1097_v14 }
 0x27a   : > { %v1078_v54 = vadd.f32 %v1076_v36, %v1060_v51 }
 0x27b   : > { %v1133_v42 = vadd.f32 %v1131_v48, %v1115_v26 }
 0x27c   : > { %v2485_v30 = vpop.permute.xlu1 %1137  ;;  %v2487_v31 = vpop.permute.xlu0 %1099 }
 0x27d   : > { %v1158_v32 = vpop.permute.xlu2 %1157  ;;  %v1142_v47 = vsel %vm2716_vm7, %v2485_v30, %v1140_v29  ;;  %v1165_v29 = vstv %s2530_s17 }
 0x27e   : > { %v1146_v21 = vsel %vm281_vm10, %v1142_v47, 0.0  ;;  %vm2718_vm10 = vcmask 637952  }
 0x27f   : > { %v1149_v35 = vmul.f32 %v1147_v20, %v1146_v21  ;;  %v1087_v41 = vsel %vm2718_vm10, %v2479_v24, %v2477_v49 }
 0x281   : > { %v1151_v52 = vadd.f32 %v1149_v35, %v1133_v42 }
 0x284   : > { %v2498_v33 = vpop.permute.xlu1 %1155  ;;  %v2500_v34 = vpop.permute.xlu0 %1117 }
 0x285   : > { %v1176_v40 = vpop.permute.xlu2 %1175  ;;  %v1160_v16 = vsel %vm713_vm13, %v2498_v33, %v1158_v32  ;;  %v1123_v1 = vsel %vm2720_vm15, %v2500_v34, %v2481_v46  ;;  %v1219_v34 = vstv %s2561_s19 }
 0x286   : > { %v1164_v32 = vsel %vm289_vm9, %v1160_v16, 0.0  ;;  %vm2719_vm9 = vcmask 629760   ;;  %v1127_v46 = vsel %vm312_vm12, %v1123_v1, 0.0 }
 0x287   : > { %v1105_v11 = vsel %vm2719_vm9, %v2487_v31, %v2483_v28  ;;  %v1167_v44 = vmul.f32 %v1165_v29, %v1164_v32  ;;  %v1130_v4 = vmul.f32 %v1129_v10, %v1127_v46 }
 0x288   : > { %v1109_v49 = vsel %vm304_vm8, %v1105_v11, 0.0 }
 0x289   : > { %v1169_v61 = vadd.f32 %v1167_v44, %v1151_v52  ;;  %v1112_v0 = vmul.f32 %v1111_v62, %v1109_v49 }
 0x28c   : > { %v2524_v45 = vpop.permute.xlu1 %1173  ;;  %v1136_v55 = vpop.permute.xlu0 %1135 }
 0x28d   : > { %v2541_v8 = vpop.permute.xlu2 %1171  ;;  %v1178_v39 = vsel %vm732_vm2, %v2524_v45, %v1176_v40  ;;  %v1094_v40 = vmul.f32 %v1093_v53, %v1087_v41  ;;  %v1141_v28 = vsel %vm2721_vm6, %v1136_v55, %v2485_v30 }
 0x28e   : > { %v1185_v50 = vmul.f32 %v1183_v38, %v1178_v39  ;;  %v1145_v55 = vsel %vm280_vm5, %v1141_v28, 0.0  ;;  %v1177_v57 = vsel %vm732_vm2, %v2541_v8, %v2524_v45 }
 0x28f   : > { %v1096_v6 = vadd.f32 %v1094_v40, %v1078_v54  ;;  %v1148_v14 = vmul.f32 %v1147_v20, %v1145_v55  ;;  %v1184_v21 = vmul.f32 %v1183_v38, %v1177_v57 }
 0x290   : > { %v1187_v3 = vadd.f32 %v1185_v50, %v1169_v61 }
 0x291   : > { %v1114_v13 = vadd.f32 %v1112_v0, %v1096_v6 }
 0x293   : > { %v1132_v62 = vadd.f32 %v1130_v4, %v1114_v13 }
 0x294   : > { %v1194_v23 = vpop.permute.xlu1 %1193  ;;  %v1154_v25 = vpop.permute.xlu0 %1153 }
 0x295   : > { %v1212_v2 = vpop.permute.xlu2 %1211  ;;  %v1159_v5 = vsel %vm713_vm13, %v1154_v25, %v2498_v33  ;;  %v1150_v18 = vadd.f32 %v1148_v14, %v1132_v62 }
 0x296   : > { %v1163_v58 = vsel %vm288_vm4, %v1159_v5, 0.0 }
 0x297   : > { %v1166_v16 = vmul.f32 %v1165_v29, %v1163_v58 }
 0x299   : > { %v1168_v56 = vadd.f32 %v1166_v16, %v1150_v18 }
 0x29b   : > { %v1186_v19 = vadd.f32 %v1184_v21, %v1168_v56 }
 0x29c   : > { %v1210_v24 = vpop.permute.xlu1 %1209  ;;  %v1192_v60 = vpop.permute.xlu0 %1191 }
 0x29d   : > { %v1214_v31 = vsel %vm770_vm0, %v1210_v24, %v1212_v2  ;;  %v1196_v43 = vsel %vm751_vm11, %v1192_v60, %v1194_v23 }
 0x29e   : > { %v1218_v53 = vsel %vm313_vm1, %v1214_v31, 0.0  ;;  %v1200_v63 = vsel %vm305_vm14, %v1196_v43, 0.0  ;;  %v1265_v43 = vld.sshfl [vmem:[#allocation1] sm:$0xff pattern:$0x75316420]  ;;  %vm2723_vm1 = vcmask 1043456  }
 0x29f   : > { %v1203_v30 = vmul.f32 %v1201_v59, %v1200_v63  ;;  %v1221_v7 = vmul.f32 %v1219_v34, %v1218_v53 }
 0x2a1   : > { %v1205_v47 = vadd.f32 %v1203_v30, %v1187_v3 }
 0x2a3   : > { %v1223_v37 = vadd.f32 %v1221_v7, %v1205_v47 }
 0x2a4   : > { %v1190_v15 = vpop.permute.xlu0 %1189 }
 0x2a5   : > { %v1437_v17 = vmul.f32 -1.442695, %v1223_v37  ;;  %v1195_v33 = vsel %vm751_vm11, %v1190_v15, %v1192_v60 }
 0x2a6   : > { %v1199_v10 = vsel %vm304_vm8, %v1195_v33, 0.0 }
 0x2a7   : > { %1530 = vpow2.f32 %v1437_v17  ;;  %v1202_v23 = vmul.f32 %v1201_v59, %v1199_v10 }
 0x2a9   : > { %v1204_v32 = vadd.f32 %v1202_v23, %v1186_v19 }
 0x2ac   : > { %v1208_v20 = vpop.permute.xlu0 %1207 }
 0x2ad   : > { %v1531_v25 = vpop.eup %1530  ;;  %v1213_v26 = vsel %vm770_vm0, %v1208_v20, %v1210_v24  ;;  %v1266_v24 = vld.sshfl [vmem:[#allocation1 + $0x8] sm:$0xff pattern:$0x75316420] }
 0x2ae   : > { %v1231_v27 = vadd.f32 1.0, %v1531_v25  ;;  %v1217_v29 = vsel %vm312_vm12, %v1213_v26, 0.0 }
 0x2af   : > { %v1220_v48 = vmul.f32 %v1219_v34, %v1217_v29 }
 0x2b0   : > { %1532 = vrcp.f32 %v1231_v27  ;;  %v1258_v42 = vand.u32 2147483648, %v1231_v27  ;;  %vm1252_vm0 = vweird.f32 %v1231_v27  ;;  %v1256_v22 = vand.u32 2147483647, %v1231_v27 }
 0x2b1   : > { %v1222_v35 = vadd.f32 %v1220_v48, %v1204_v32 }
 0x2b2   : > { %v1259_v51 = vor.u32 1.1754944e-38, %v1258_v42  ;;  %vm1257_vm8 = vcmp.eq.f32.partialorder %v1256_v22, 8.507059e+37 }
 0x2b3   : > { %v1436_v45 = vmul.f32 -1.442695, %v1222_v35 }
 0x2b5   : > { %1534 = vpow2.f32 %v1436_v45 }
 0x2b6   : > { %v1533_v9 = vpop.eup %1532 }
 0x2b7   : > { %v1248_v8 = vmul.f32 %v1533_v9, %v1231_v27  ;;  %vm1253_vm4 = vweird.f32 %v1533_v9 }
 0x2b8   : > { %vm1254_vm5 = vmor %vm1252_vm0, %vm1253_vm4 }
 0x2b9   : > { %v1249_v12 = vsub.f32 1.0, %v1248_v8 }
 0x2bb   : > { %v1535_v36 = vpop.eup %1534  ;;  %v1250_v38 = vmul.f32 %v1533_v9, %v1249_v12 }
 0x2bc   : > { %v1230_v39 = vadd.f32 1.0, %v1535_v36 }
 0x2bd   : > { %v1251_v41 = vadd.f32 %v1533_v9, %v1250_v38 }
 0x2be   : > { %1536 = vrcp.f32 %v1230_v39  ;;  %v1243_v2 = vand.u32 2147483648, %v1230_v39  ;;  %v1241_v54 = vand.u32 2147483647, %v1230_v39  ;;  %vm1237_vm12 = vweird.f32 %v1230_v39 }
 0x2bf   : > { %v1255_v11 = vsel %vm1254_vm5, %v1533_v9, %v1251_v41 }
 0x2c0   : > { %v1260_v1 = vsel %vm1257_vm8, %v1259_v51, %v1255_v11  ;;  %v1244_v60 = vor.u32 1.1754944e-38, %v1243_v2  ;;  %vm1242_vm14 = vcmp.eq.f32.partialorder %v1241_v54, 8.507059e+37 }
 0x2c1   : > { %v1263_v49 = vperm.slane %v1260_v1, 0 }
 0x2c3   : > { %v1270_v28 = vmul.f32 %v1266_v24, %v1263_v49 }
 0x2c4   : > { %v1537_v44 = vpop.eup %1536 }
 0x2c5   : > { %v1233_v52 = vmul.f32 %v1537_v44, %v1230_v39  ;;  %vm1238_vm11 = vweird.f32 %v1537_v44  ;;  %v1273_v53 = vrot.slane %v1270_v28, 4 }
 0x2c6   : > { %vm1239_vm13 = vmor %vm1237_vm12, %vm1238_vm11 }
 0x2c7   : > { %v1234_v50 = vsub.f32 1.0, %v1233_v52 }
 0x2c9   : > { %v1235_v40 = vmul.f32 %v1537_v44, %v1234_v50 }
 0x2cb   : > { %v1236_v59 = vadd.f32 %v1537_v44, %v1235_v40 }
 0x2cd   : > { %v1240_v61 = vsel %vm1239_vm13, %v1537_v44, %v1236_v59 }
 0x2ce   : > { %v1245_v31 = vsel %vm1242_vm14, %v1244_v60, %v1240_v61 }
 0x2cf   : > { %v1262_v46 = vperm.slane %v1245_v31, 0 }
 0x2d1   : > { %v1269_v34 = vmul.f32 %v1265_v43, %v1262_v46 }
 0x2d3   : > { %v1274_v63 = vsel %vm2723_vm1, %v1269_v34, %v1273_v53 }
 0x2d4   : > { %1276 = vst [vmem:[%s175_s5] sm:$0xff] %v1274_v63 }
 0x2d5   : > { %1610 = shalt.err (!%p1607_p11)
}
 0x2d6   : > { %1451 = dma.vmem_to_hbm [thread:$0]  (%p1763_p3), %s1292_s13, 128, %s1294_s28, %s1278_s3  }
 0x2d7 PF: > { %s1305_s27 = sand.u32 1, %s1641_s9   ;;  %p2724_p12 = scmp.ge.s32.totalorder %s1653_s12, 2 }
 0x2d8   : > { %s1306_s18 = scalar_lea.sflag [#allocation4], %s1305_s27 }
 0x2d9   : > { %p1462_p13 = pnand %p2724_p12, %p1732_p6 }
 0x2db   : > { %p1463_p0 = pneg %p1462_p13 }
 0x2dd   : > { %1636 = dma.done.wait (%p1463_p0), %s1306_s18, 128  }
 0x2de   : > { %1638 = vsyncadd (%p1463_p0), %s1306_s18, 4294967168  ;;  %p16_p5 = scmp.ge.s32.totalorder %s1748_s21, 4   ;;  %s2725_s9 = smov %s1645_s10 }
 0x2df   : > { %s2726_s10 = smov %s1649_s11  ;;  %s2727_s11 = smov %s1758_s25 }
 0x2e0   : > { %s2728_s12 = smov %s1748_s21  ;;  %18 = sbr.rel (!%p16_p5) target bundleno = 6 (0x6), region = 78 }
 0x2e5   :  { %1312 = vsyncpa [#allocation3], 1 }
 0x2e6   :  { %1314 = vsyncpa [#allocation3 + $0x1], 1 }
 0x2e7   :  { %1315 = vsyncpa [#allocation4], 1 }
 0x2e8   :  { %1317 = vsyncpa [#allocation4 + $0x1], 1 }
 0x2e9   :  { %1318 = vsyncpa [#allocation5], 1 }
 0x2ea   :  { %1320 = vsyncpa [#allocation5 + $0x1], 1 }

</bundles_post_ra>
